<compile_context>
chip_gen: v7x
topology: tpu7x:2x2x1
jax: 0.10.0
libtpu: 0.0.40
codegen_flags: <defaults>
</compile_context>

<pallas_src>
import functools

import jax
import jax.numpy as jnp
from jax.experimental import pallas as pl
from jax.experimental.pallas import tpu as pltpu


def _fit(target, dim):
    """Largest-or-whole tile: use `target` if it divides dim, else the whole dim."""
    return target if (dim > target and dim % target == 0) else dim


# ---------------------------------------------------------------------------
# tiled linear kernel:  out = x @ W + b   (bf16 MXU operands, f32 accumulate)
# ---------------------------------------------------------------------------
def _linear_kernel(x_ref, w_ref, b_ref, o_ref, acc_ref):
    @pl.when(pl.program_id(2) == 0)
    def _():
        acc_ref[...] = jnp.zeros_like(acc_ref)

    acc_ref[...] += jnp.dot(x_ref[...].astype(jnp.bfloat16),
                            w_ref[...].astype(jnp.bfloat16),
                            preferred_element_type=jnp.float32)

    @pl.when(pl.program_id(2) == pl.num_programs(2) - 1)
    def _():
        o_ref[...] = (acc_ref[...] + b_ref[...]).astype(o_ref.dtype)


def linear(x, w, b, *, tm=256, tn=512, tk=512):
    M, K = x.shape
    N = w.shape[1]
    bm, bn, bk = _fit(tm, M), _fit(tn, N), _fit(tk, K)
    return pl.pallas_call(
        _linear_kernel,
        out_shape=jax.ShapeDtypeStruct((M, N), jnp.float32),
        grid=(M // bm, N // bn, K // bk),
        in_specs=[pl.BlockSpec((bm, bk), lambda i, j, k: (i, k)),
                  pl.BlockSpec((bk, bn), lambda i, j, k: (k, j)),
                  pl.BlockSpec((1, bn), lambda i, j, k: (0, j))],
        out_specs=pl.BlockSpec((bm, bn), lambda i, j, k: (i, j)),
        scratch_shapes=[pltpu.VMEM((bm, bn), jnp.float32)],
        compiler_params=pltpu.CompilerParams(
            dimension_semantics=("parallel", "parallel", "arbitrary")),
    )(x, w, b)


# ---------------------------------------------------------------------------
# fused token-embedder kernel:
#   char CNN (im2col, one dot per filter) -> max over time -> relu
#   -> highway layers (split nonlinear / gate weights)
#   -> concat with word embedding -> projection
# ---------------------------------------------------------------------------
def _token_embedder_kernel(filters, seq_len, n_highway, xc_ref, word_ref, *refs):
    out_ref = refs[-1]
    x = xc_ref[...].astype(jnp.bfloat16)                  # (R, L, D)
    rows = x.shape[0]

    idx = 0
    feats = []
    for (w, n) in filters:
        cw = refs[idx][...].astype(jnp.bfloat16)          # (w*D, n)
        cb = refs[idx + 1][...]                           # (1, n)
        idx += 2
        npos = seq_len - w + 1
        # im2col: stack all sliding windows along the row axis -> one MXU dot
        windows = [jnp.concatenate([x[:, p + k, :] for k in range(w)], axis=-1)
                   for p in range(npos)]
        win = jnp.concatenate(windows, axis=0)            # (npos*R, w*D)
        y = jnp.dot(win, cw, preferred_element_type=jnp.float32)   # (npos*R, n)
        best = y[0:rows, :]
        for p in range(1, npos):
            best = jnp.maximum(best, y[p * rows:(p + 1) * rows, :])
        feats.append(jnp.maximum(best + cb, 0.0))         # max-pool, bias, relu
    h = jnp.concatenate(feats, axis=-1)                   # (R, F)

    for _ in range(n_highway):
        w_nl = refs[idx][...].astype(jnp.bfloat16)        # (F, F)
        b_nl = refs[idx + 1][...]
        w_g = refs[idx + 2][...].astype(jnp.bfloat16)     # (F, F)
        b_g = refs[idx + 3][...]
        idx += 4
        hb = h.astype(jnp.bfloat16)
        nonlin = jnp.maximum(
            jnp.dot(hb, w_nl, preferred_element_type=jnp.float32) + b_nl, 0.0)
        gate = jax.nn.sigmoid(
            jnp.dot(hb, w_g, preferred_element_type=jnp.float32) + b_g)
        h = gate * h + (1.0 - gate) * nonlin

    pw = refs[idx][...].astype(jnp.bfloat16)              # (word_dim + F, P)
    pb = refs[idx + 1][...]                               # (1, P)
    emb = jnp.concatenate([word_ref[...], h], axis=-1).astype(jnp.bfloat16)
    out_ref[...] = (jnp.dot(emb, pw, preferred_element_type=jnp.float32)
                    + pb).astype(out_ref.dtype)


def token_embedder(word_ids, char_ids, te_params, filters):
    # word_ids: (R,) int32 (time-major flattened), char_ids: (R, L) int32
    # TODO(synk): embedding-table gathers have no clean tiled-Pallas form; done with jnp.take.
    R = word_ids.shape[0]
    L = char_ids.shape[-1]
    word_emb = jnp.take(te_params['word_emb'], word_ids, axis=0)          # (R, Wd)
    char_emb = jnp.take(te_params['char_emb'], char_ids.reshape(-1), axis=0)
    char_emb = char_emb.reshape(R, L, -1)                                 # (R, L, D)
    D = char_emb.shape[-1]
    word_dim = word_emb.shape[-1]
    F = sum(n for _, n in filters)
    P = te_params['proj_w'].shape[1]

    tr = _fit(256, R)
    args = [char_emb, word_emb]
    in_specs = [pl.BlockSpec((tr, L, D), lambda i: (i, 0, 0)),
                pl.BlockSpec((tr, word_dim), lambda i: (i, 0))]
    for (w, n), cw, cb in zip(filters, te_params['conv_w'], te_params['conv_b']):
        args += [cw.reshape(w * D, n), cb]
        in_specs += [pl.BlockSpec((w * D, n), lambda i: (0, 0)),
                     pl.BlockSpec((1, n), lambda i: (0, 0))]
    for hw, hb in te_params['highway']:
        # split Linear(F, 2F) into the nonlinear half and the gate half
        args += [hw[:, :F], hb[:, :F], hw[:, F:], hb[:, F:]]
        in_specs += [pl.BlockSpec((F, F), lambda i: (0, 0)),
                     pl.BlockSpec((1, F), lambda i: (0, 0)),
                     pl.BlockSpec((F, F), lambda i: (0, 0)),
                     pl.BlockSpec((1, F), lambda i: (0, 0))]
    args += [te_params['proj_w'], te_params['proj_b']]
    in_specs += [pl.BlockSpec((word_dim + F, P), lambda i: (0, 0)),
                 pl.BlockSpec((1, P), lambda i: (0, 0))]

    kernel = functools.partial(_token_embedder_kernel, filters, L,
                               len(te_params['highway']))
    return pl.pallas_call(
        kernel,
        out_shape=jax.ShapeDtypeStruct((R, P), jnp.float32),
        grid=(R // tr,),
        in_specs=in_specs,
        out_specs=pl.BlockSpec((tr, P), lambda i: (i, 0)),
        compiler_params=pltpu.CompilerParams(dimension_semantics=("parallel",)),
    )(*args)


# ---------------------------------------------------------------------------
# bidirectional LSTM-with-projection layer:
#   grid=(2,) over directions, full time recurrence inside one invocation
# ---------------------------------------------------------------------------
def _bilstm_layer_kernel(tlen, cell, cell_clip, proj_clip,
                         px_ref, mask_ref, ws_ref, wp_ref,
                         h_out_ref, h_scr, c_scr):
    # px_ref   : (T, B, 4C)  = x @ W_in + b_state   (per direction, f32)
    # mask_ref : (T, B, 1)
    # ws_ref   : (H, 4C) bf16   wp_ref : (C, H) bf16
    # h_out_ref: (T, B, H)
    d = pl.program_id(0)                  # 0 = forward, 1 = backward
    h_scr[...] = jnp.zeros_like(h_scr)
    c_scr[...] = jnp.zeros_like(c_scr)
    ws = ws_ref[...]
    wp = wp_ref[...]

    @pl.loop(0, tlen)
    def _(t):
        # forward: tt = t ; backward: tt = tlen-1-t   (scalar int arithmetic)
        tt = t + d * (tlen - 1 - 2 * t)
        px_t = px_ref[tt]                                  # (B, 4C)
        m = mask_ref[tt]                                   # (B, 1)
        h_prev = h_scr[...]
        c_prev = c_scr[...]
        gates = px_t + jnp.dot(h_prev.astype(jnp.bfloat16), ws,
                               preferred_element_type=jnp.float32)
        i_g = jax.nn.sigmoid(gates[:, 0 * cell:1 * cell])
        f_g = jax.nn.sigmoid(gates[:, 1 * cell:2 * cell])
        g_g = jnp.tanh(gates[:, 2 * cell:3 * cell])
        o_g = jax.nn.sigmoid(gates[:, 3 * cell:4 * cell])
        c_new = i_g * g_g + f_g * c_prev
        if cell_clip is not None and cell_clip > 0:        # AllenNLP: clamp only if set
            c_new = jnp.clip(c_new, -cell_clip, cell_clip)
        h_new = jnp.dot((o_g * jnp.tanh(c_new)).astype(jnp.bfloat16), wp,
                        preferred_element_type=jnp.float32)
        if proj_clip is not None and proj_clip > 0:
            h_new = jnp.clip(h_new, -proj_clip, proj_clip)
        # packed-sequence semantics: padded steps emit zeros and freeze state
        c_scr[...] = m * c_new + (1.0 - m) * c_prev
        h_scr[...] = m * h_new + (1.0 - m) * h_prev
        h_out_ref[tt] = (m * h_new).astype(h_out_ref.dtype)


def bilstm_layer(x_fwd, x_bwd, mask_tb1, layer_params,
                 cell_clip=3.0, proj_clip=3.0):
    # x_fwd, x_bwd: (T, B, D) time-major inputs of the two directions
    tlen, bsz, d_in = x_fwd.shape
    (wi_f, ws_f, bs_f, wp_f), (wi_b, ws_b, bs_b, wp_b) = layer_params
    cell, hidden = wp_f.shape

    # fold the recurrent bias into the big batched input projection
    px_f = linear(x_fwd.reshape(tlen * bsz, d_in), wi_f, bs_f).reshape(tlen, bsz, 4 * cell)
    px_b = linear(x_bwd.reshape(tlen * bsz, d_in), wi_b, bs_b).reshape(tlen, bsz, 4 * cell)
    px = jnp.stack([px_f, px_b], axis=0)                         # (2, T, B, 4C)
    ws = jnp.stack([ws_f, ws_b], axis=0).astype(jnp.bfloat16)    # (2, H, 4C)
    wp = jnp.stack([wp_f, wp_b], axis=0).astype(jnp.bfloat16)    # (2, C, H)

    kernel = functools.partial(_bilstm_layer_kernel, tlen, cell,
                               cell_clip, proj_clip)
    h = pl.pallas_call(
        kernel,
        out_shape=jax.ShapeDtypeStruct((2, tlen, bsz, hidden), jnp.float32),
        grid=(2,),      # direction axis: fwd / bwd -> split across TCs on v7x
        in_specs=[pl.BlockSpec((None, tlen, bsz, 4 * cell), lambda d: (d, 0, 0, 0)),
                  pl.BlockSpec((tlen, bsz, 1), lambda d: (0, 0, 0)),
                  pl.BlockSpec((None, hidden, 4 * cell), lambda d: (d, 0, 0)),
                  pl.BlockSpec((None, cell, hidden), lambda d: (d, 0, 0))],
        out_specs=pl.BlockSpec((None, tlen, bsz, hidden), lambda d: (d, 0, 0, 0)),
        scratch_shapes=[pltpu.VMEM((bsz, hidden), jnp.float32),
                        pltpu.VMEM((bsz, cell), jnp.float32)],
        compiler_params=pltpu.CompilerParams(dimension_semantics=("parallel",)),
    )(px, mask_tb1, ws, wp)
    return h[0], h[1]                                            # each (T, B, H)


# ---------------------------------------------------------------------------
# module-level wrappers (glue)
# ---------------------------------------------------------------------------
def elmo_bilstm(tok_tm, mask_tb1, enc_params, cell_clip=3.0, proj_clip=3.0):
    fwd_seq = bwd_seq = tok_tm                                   # (T, B, P)
    outputs = []
    for layer_idx, layer_params in enumerate(zip(enc_params['fwd'],
                                                 enc_params['bwd'])):
        f_out, b_out = bilstm_layer(fwd_seq, bwd_seq, mask_tb1, layer_params,
                                    cell_clip, proj_clip)
        if layer_idx != 0:                    # residual skip (AllenNLP ElmoLstm)
            f_out = f_out + fwd_seq
            b_out = b_out + bwd_seq
        fwd_seq, bwd_seq = f_out, b_out
        outputs.append(jnp.concatenate([f_out, b_out], axis=-1))  # (T, B, 2P)
    return jnp.stack(outputs, axis=0)                             # (L, T, B, 2P)


def model_forward(word_inp, chars_inp, mask_package, params, filters,
                  cell_clip=3.0, proj_clip=3.0):
    bsz, tlen = word_inp.shape
    mask = mask_package[0].astype(jnp.float32)                    # (B, T)

    # transpose only the tiny integer id tensors -> everything downstream is time-major
    word_ids = word_inp.T.reshape(-1)                             # (T*B,)
    char_ids = chars_inp.transpose(1, 0, 2).reshape(tlen * bsz, -1)

    tok = token_embedder(word_ids, char_ids, params['token_embedder'], filters)
    proj_dim = tok.shape[-1]
    tok_tm = tok.reshape(tlen, bsz, proj_dim)                     # (T, B, P)
    mask_tb1 = mask.T[:, :, None]                                 # (T, B, 1)

    enc = elmo_bilstm(tok_tm, mask_tb1, params['encoder'], cell_clip, proj_clip)
    tok2 = jnp.concatenate([tok_tm, tok_tm], axis=-1)[None]       # (1, T, B, 2P)
    out_tm = jnp.concatenate([tok2, enc], axis=0)                 # (L+1, T, B, 2P)
    return out_tm.transpose(0, 2, 1, 3)                           # (L+1, B, T, 2P)


# ---------------------------------------------------------------------------
# deterministic parameter initialization
# ---------------------------------------------------------------------------
def init_params(key, config):
    te = config['token_embedder']
    enc = config['encoder']
    filters = [tuple(f) for f in te['filters']]
    proj_dim = enc['projection_dim']
    cell_dim = enc['dim']
    n_layers = enc['n_layers']
    n_filters = sum(n for _, n in filters)
    word_dim = te['word_dim']
    char_dim = te['char_dim']
    emb_dim = word_dim + n_filters

    state = {'key': key}

    def rnd(shape, scale=0.1):
        state['key'], sub = jax.random.split(state['key'])
        return scale * jax.random.normal(sub, shape, jnp.float32)

    params = {
        'token_embedder': {
            'word_emb': rnd((config['word_vocab'], word_dim), 0.5),
            'char_emb': rnd((config['char_vocab'], char_dim), 0.5),
            'conv_w': [rnd((w, char_dim, n)) for w, n in filters],
            'conv_b': [rnd((1, n)) for _, n in filters],
            'highway': [(rnd((n_filters, 2 * n_filters)), rnd((1, 2 * n_filters)))
                        for _ in range(te['n_highway'])],
            'proj_w': rnd((emb_dim, proj_dim)),
            'proj_b': rnd((1, proj_dim)),
        },
        'encoder': {'fwd': [], 'bwd': []},
    }
    d_in = proj_dim
    for _ in range(n_layers):
        for direction in ('fwd', 'bwd'):
            params['encoder'][direction].append((
                rnd((d_in, 4 * cell_dim)),        # input_linearity  (bias=False)
                rnd((proj_dim, 4 * cell_dim)),    # state_linearity  weight
                rnd((1, 4 * cell_dim)),           # state_linearity  bias
                rnd((cell_dim, proj_dim)),        # state_projection (bias=False)
            ))
        d_in = proj_dim
    return params


if __name__ == "__main__":
    config = {
        'token_embedder': {'char_dim': 16, 'word_dim': 16,
                           'filters': [[1, 8], [2, 8], [3, 16]],
                           'n_highway': 1, 'activation': 'relu',
                           'max_characters_per_token': 8},
        'encoder': {'projection_dim': 32, 'dim': 64, 'n_layers': 2},
        'word_vocab': 50, 'char_vocab': 30,
    }
    filters = [tuple(f) for f in config['token_embedder']['filters']]
    B, T = 2, 8
    L = config['token_embedder']['max_characters_per_token']

    key = jax.random.PRNGKey(0)
    k_params, k_word, k_char = jax.random.split(key, 3)
    params = init_params(k_params, config)

    word_inp = jax.random.randint(k_word, (B, T), 0, config['word_vocab'], jnp.int32)
    chars_inp = jax.random.randint(k_char, (B, T, L), 0, config['char_vocab'], jnp.int32)
    # lengths [8, 6] — exercises the mask / packed-sequence path
    mask = jnp.array([[1.0] * 8, [1.0] * 6 + [0.0] * 2], jnp.float32)

    out = model_forward(word_inp, chars_inp, (mask,), params, filters)
    out = jax.block_until_ready(out)
    assert out.shape == (config['encoder']['n_layers'] + 1, B, T,
                         2 * config['encoder']['projection_dim']), out.shape
    assert out.dtype == jnp.float32
    print("KERNEL_OK")
</pallas_src>

<mosaic_0001>
module attributes {stable_mosaic.version = 11 : i64} {
  func.func @_token_embedder_kernel(%arg0: i32, %arg1: memref<16x8x16xf32, #tpu.memory_space<vmem>>, %arg2: memref<16x16xf32, #tpu.memory_space<vmem>>, %arg3: memref<16x8xf32, #tpu.memory_space<vmem>>, %arg4: memref<1x8xf32, #tpu.memory_space<vmem>>, %arg5: memref<32x8xf32, #tpu.memory_space<vmem>>, %arg6: memref<1x8xf32, #tpu.memory_space<vmem>>, %arg7: memref<48x16xf32, #tpu.memory_space<vmem>>, %arg8: memref<1x16xf32, #tpu.memory_space<vmem>>, %arg9: memref<32x32xf32, #tpu.memory_space<vmem>>, %arg10: memref<1x32xf32, #tpu.memory_space<vmem>>, %arg11: memref<32x32xf32, #tpu.memory_space<vmem>>, %arg12: memref<1x32xf32, #tpu.memory_space<vmem>>, %arg13: memref<48x32xf32, #tpu.memory_space<vmem>>, %arg14: memref<1x32xf32, #tpu.memory_space<vmem>>, %arg15: memref<16x32xf32, #tpu.memory_space<vmem>>) attributes {dimension_semantics = [#tpu.dimension_semantics<parallel>], iteration_bounds = array<i64: 1>, scalar_prefetch = 0 : i64, scratch_operands = 0 : i64, tpu.core_type = #tpu.core_type<tc>, window_params = [{transform_indices = @transform_0, window_bounds = array<i64: 16, 8, 16>}, {transform_indices = @transform_1, window_bounds = array<i64: 16, 16>}, {pipeline_mode = #tpu.pipeline_mode<synchronous>, transform_indices = @transform_2, window_bounds = array<i64: 16, 8>}, {pipeline_mode = #tpu.pipeline_mode<synchronous>, transform_indices = @transform_3, window_bounds = array<i64: 1, 8>}, {pipeline_mode = #tpu.pipeline_mode<synchronous>, transform_indices = @transform_4, window_bounds = array<i64: 32, 8>}, {pipeline_mode = #tpu.pipeline_mode<synchronous>, transform_indices = @transform_5, window_bounds = array<i64: 1, 8>}, {pipeline_mode = #tpu.pipeline_mode<synchronous>, transform_indices = @transform_6, window_bounds = array<i64: 48, 16>}, {pipeline_mode = #tpu.pipeline_mode<synchronous>, transform_indices = @transform_7, window_bounds = array<i64: 1, 16>}, {pipeline_mode = #tpu.pipeline_mode<synchronous>, transform_indices = @transform_8, window_bounds = array<i64: 32, 32>}, {pipeline_mode = #tpu.pipeline_mode<synchronous>, transform_indices = @transform_9, window_bounds = array<i64: 1, 32>}, {pipeline_mode = #tpu.pipeline_mode<synchronous>, transform_indices = @transform_10, window_bounds = array<i64: 32, 32>}, {pipeline_mode = #tpu.pipeline_mode<synchronous>, transform_indices = @transform_11, window_bounds = array<i64: 1, 32>}, {pipeline_mode = #tpu.pipeline_mode<synchronous>, transform_indices = @transform_12, window_bounds = array<i64: 48, 32>}, {pipeline_mode = #tpu.pipeline_mode<synchronous>, transform_indices = @transform_13, window_bounds = array<i64: 1, 32>}, {transform_indices = @transform_14, window_bounds = array<i64: 16, 32>}]} {
    %c0 = arith.constant 0 : index
    %c0_0 = arith.constant 0 : index
    %c0_1 = arith.constant 0 : index
    %0 = vector.load %arg1[%c0, %c0_0, %c0_1] : memref<16x8x16xf32, #tpu.memory_space<vmem>>, vector<16x8x16xf32>
    %1 = arith.truncf %0 : vector<16x8x16xf32> to vector<16x8x16xbf16>
    %c0_2 = arith.constant 0 : index
    %c0_3 = arith.constant 0 : index
    %2 = vector.load %arg3[%c0_2, %c0_3] : memref<16x8xf32, #tpu.memory_space<vmem>>, vector<16x8xf32>
    %3 = arith.truncf %2 : vector<16x8xf32> to vector<16x8xbf16>
    %c0_4 = arith.constant 0 : index
    %c0_5 = arith.constant 0 : index
    %4 = vector.load %arg4[%c0_4, %c0_5] : memref<1x8xf32, #tpu.memory_space<vmem>>, vector<1x8xf32>
    %5 = vector.extract_strided_slice %1 {offsets = [0, 0, 0], sizes = [16, 1, 16], strides = [1, 1, 1]} : vector<16x8x16xbf16> to vector<16x1x16xbf16>
    %6 = vector.shape_cast %5 : vector<16x1x16xbf16> to vector<16x16xbf16>
    %7 = vector.extract_strided_slice %1 {offsets = [0, 1, 0], sizes = [16, 1, 16], strides = [1, 1, 1]} : vector<16x8x16xbf16> to vector<16x1x16xbf16>
    %8 = vector.shape_cast %7 : vector<16x1x16xbf16> to vector<16x16xbf16>
    %9 = vector.extract_strided_slice %1 {offsets = [0, 2, 0], sizes = [16, 1, 16], strides = [1, 1, 1]} : vector<16x8x16xbf16> to vector<16x1x16xbf16>
    %10 = vector.shape_cast %9 : vector<16x1x16xbf16> to vector<16x16xbf16>
    %11 = vector.extract_strided_slice %1 {offsets = [0, 3, 0], sizes = [16, 1, 16], strides = [1, 1, 1]} : vector<16x8x16xbf16> to vector<16x1x16xbf16>
    %12 = vector.shape_cast %11 : vector<16x1x16xbf16> to vector<16x16xbf16>
    %13 = vector.extract_strided_slice %1 {offsets = [0, 4, 0], sizes = [16, 1, 16], strides = [1, 1, 1]} : vector<16x8x16xbf16> to vector<16x1x16xbf16>
    %14 = vector.shape_cast %13 : vector<16x1x16xbf16> to vector<16x16xbf16>
    %15 = vector.extract_strided_slice %1 {offsets = [0, 5, 0], sizes = [16, 1, 16], strides = [1, 1, 1]} : vector<16x8x16xbf16> to vector<16x1x16xbf16>
    %16 = vector.shape_cast %15 : vector<16x1x16xbf16> to vector<16x16xbf16>
    %17 = vector.extract_strided_slice %1 {offsets = [0, 6, 0], sizes = [16, 1, 16], strides = [1, 1, 1]} : vector<16x8x16xbf16> to vector<16x1x16xbf16>
    %18 = vector.shape_cast %17 : vector<16x1x16xbf16> to vector<16x16xbf16>
    %19 = vector.extract_strided_slice %1 {offsets = [0, 7, 0], sizes = [16, 1, 16], strides = [1, 1, 1]} : vector<16x8x16xbf16> to vector<16x1x16xbf16>
    %20 = vector.shape_cast %19 : vector<16x1x16xbf16> to vector<16x16xbf16>
    %21 = tpu.concatenate %6, %8, %10, %12, %14, %16, %18, %20 in 0 : vector<16x16xbf16>, vector<16x16xbf16>, vector<16x16xbf16>, vector<16x16xbf16>, vector<16x16xbf16>, vector<16x16xbf16>, vector<16x16xbf16>, vector<16x16xbf16> -> vector<128x16xbf16>
    %cst = arith.constant dense<0.000000e+00> : vector<128x8xf32>
    %22 = tpu.matmul %21, %3, %cst {dimension_numbers = #tpu.dot_dimension_numbers<[1], [0], [0], [1], [0, 0, 1, 1], [], []>} : vector<128x16xbf16>, vector<16x8xbf16>, vector<128x8xf32> -> vector<128x8xf32>
    %23 = vector.extract_strided_slice %22 {offsets = [0, 0], sizes = [16, 8], strides = [1, 1]} : vector<128x8xf32> to vector<16x8xf32>
    %24 = vector.extract_strided_slice %22 {offsets = [16, 0], sizes = [16, 8], strides = [1, 1]} : vector<128x8xf32> to vector<16x8xf32>
    %25 = arith.maximumf %23, %24 : vector<16x8xf32>
    %26 = vector.extract_strided_slice %22 {offsets = [32, 0], sizes = [16, 8], strides = [1, 1]} : vector<128x8xf32> to vector<16x8xf32>
    %27 = arith.maximumf %25, %26 : vector<16x8xf32>
    %28 = vector.extract_strided_slice %22 {offsets = [48, 0], sizes = [16, 8], strides = [1, 1]} : vector<128x8xf32> to vector<16x8xf32>
    %29 = arith.maximumf %27, %28 : vector<16x8xf32>
    %30 = vector.extract_strided_slice %22 {offsets = [64, 0], sizes = [16, 8], strides = [1, 1]} : vector<128x8xf32> to vector<16x8xf32>
    %31 = arith.maximumf %29, %30 : vector<16x8xf32>
    %32 = vector.extract_strided_slice %22 {offsets = [80, 0], sizes = [16, 8], strides = [1, 1]} : vector<128x8xf32> to vector<16x8xf32>
    %33 = arith.maximumf %31, %32 : vector<16x8xf32>
    %34 = vector.extract_strided_slice %22 {offsets = [96, 0], sizes = [16, 8], strides = [1, 1]} : vector<128x8xf32> to vector<16x8xf32>
    %35 = arith.maximumf %33, %34 : vector<16x8xf32>
    %36 = vector.extract_strided_slice %22 {offsets = [112, 0], sizes = [16, 8], strides = [1, 1]} : vector<128x8xf32> to vector<16x8xf32>
    %37 = arith.maximumf %35, %36 : vector<16x8xf32>
    %38 = vector.broadcast %4 : vector<1x8xf32> to vector<16x8xf32>
    %39 = arith.addf %37, %38 : vector<16x8xf32>
    %cst_6 = arith.constant 0.000000e+00 : f32
    %40 = vector.broadcast %cst_6 : f32 to vector<16x8xf32>
    %41 = arith.maximumf %39, %40 : vector<16x8xf32>
    %c0_7 = arith.constant 0 : index
    %c0_8 = arith.constant 0 : index
    %42 = vector.load %arg5[%c0_7, %c0_8] : memref<32x8xf32, #tpu.memory_space<vmem>>, vector<32x8xf32>
    %43 = arith.truncf %42 : vector<32x8xf32> to vector<32x8xbf16>
    %c0_9 = arith.constant 0 : index
    %c0_10 = arith.constant 0 : index
    %44 = vector.load %arg6[%c0_9, %c0_10] : memref<1x8xf32, #tpu.memory_space<vmem>>, vector<1x8xf32>
    %45 = vector.extract_strided_slice %1 {offsets = [0, 0, 0], sizes = [16, 1, 16], strides = [1, 1, 1]} : vector<16x8x16xbf16> to vector<16x1x16xbf16>
    %46 = vector.shape_cast %45 : vector<16x1x16xbf16> to vector<16x16xbf16>
    %47 = vector.extract_strided_slice %1 {offsets = [0, 1, 0], sizes = [16, 1, 16], strides = [1, 1, 1]} : vector<16x8x16xbf16> to vector<16x1x16xbf16>
    %48 = vector.shape_cast %47 : vector<16x1x16xbf16> to vector<16x16xbf16>
    %49 = tpu.concatenate %46, %48 in 1 : vector<16x16xbf16>, vector<16x16xbf16> -> vector<16x32xbf16>
    %50 = vector.extract_strided_slice %1 {offsets = [0, 1, 0], sizes = [16, 1, 16], strides = [1, 1, 1]} : vector<16x8x16xbf16> to vector<16x1x16xbf16>
    %51 = vector.shape_cast %50 : vector<16x1x16xbf16> to vector<16x16xbf16>
    %52 = vector.extract_strided_slice %1 {offsets = [0, 2, 0], sizes = [16, 1, 16], strides = [1, 1, 1]} : vector<16x8x16xbf16> to vector<16x1x16xbf16>
    %53 = vector.shape_cast %52 : vector<16x1x16xbf16> to vector<16x16xbf16>
    %54 = tpu.concatenate %51, %53 in 1 : vector<16x16xbf16>, vector<16x16xbf16> -> vector<16x32xbf16>
    %55 = vector.extract_strided_slice %1 {offsets = [0, 2, 0], sizes = [16, 1, 16], strides = [1, 1, 1]} : vector<16x8x16xbf16> to vector<16x1x16xbf16>
    %56 = vector.shape_cast %55 : vector<16x1x16xbf16> to vector<16x16xbf16>
    %57 = vector.extract_strided_slice %1 {offsets = [0, 3, 0], sizes = [16, 1, 16], strides = [1, 1, 1]} : vector<16x8x16xbf16> to vector<16x1x16xbf16>
    %58 = vector.shape_cast %57 : vector<16x1x16xbf16> to vector<16x16xbf16>
    %59 = tpu.concatenate %56, %58 in 1 : vector<16x16xbf16>, vector<16x16xbf16> -> vector<16x32xbf16>
    %60 = vector.extract_strided_slice %1 {offsets = [0, 3, 0], sizes = [16, 1, 16], strides = [1, 1, 1]} : vector<16x8x16xbf16> to vector<16x1x16xbf16>
    %61 = vector.shape_cast %60 : vector<16x1x16xbf16> to vector<16x16xbf16>
    %62 = vector.extract_strided_slice %1 {offsets = [0, 4, 0], sizes = [16, 1, 16], strides = [1, 1, 1]} : vector<16x8x16xbf16> to vector<16x1x16xbf16>
    %63 = vector.shape_cast %62 : vector<16x1x16xbf16> to vector<16x16xbf16>
    %64 = tpu.concatenate %61, %63 in 1 : vector<16x16xbf16>, vector<16x16xbf16> -> vector<16x32xbf16>
    %65 = vector.extract_strided_slice %1 {offsets = [0, 4, 0], sizes = [16, 1, 16], strides = [1, 1, 1]} : vector<16x8x16xbf16> to vector<16x1x16xbf16>
    %66 = vector.shape_cast %65 : vector<16x1x16xbf16> to vector<16x16xbf16>
    %67 = vector.extract_strided_slice %1 {offsets = [0, 5, 0], sizes = [16, 1, 16], strides = [1, 1, 1]} : vector<16x8x16xbf16> to vector<16x1x16xbf16>
    %68 = vector.shape_cast %67 : vector<16x1x16xbf16> to vector<16x16xbf16>
    %69 = tpu.concatenate %66, %68 in 1 : vector<16x16xbf16>, vector<16x16xbf16> -> vector<16x32xbf16>
    %70 = vector.extract_strided_slice %1 {offsets = [0, 5, 0], sizes = [16, 1, 16], strides = [1, 1, 1]} : vector<16x8x16xbf16> to vector<16x1x16xbf16>
    %71 = vector.shape_cast %70 : vector<16x1x16xbf16> to vector<16x16xbf16>
    %72 = vector.extract_strided_slice %1 {offsets = [0, 6, 0], sizes = [16, 1, 16], strides = [1, 1, 1]} : vector<16x8x16xbf16> to vector<16x1x16xbf16>
    %73 = vector.shape_cast %72 : vector<16x1x16xbf16> to vector<16x16xbf16>
    %74 = tpu.concatenate %71, %73 in 1 : vector<16x16xbf16>, vector<16x16xbf16> -> vector<16x32xbf16>
    %75 = vector.extract_strided_slice %1 {offsets = [0, 6, 0], sizes = [16, 1, 16], strides = [1, 1, 1]} : vector<16x8x16xbf16> to vector<16x1x16xbf16>
    %76 = vector.shape_cast %75 : vector<16x1x16xbf16> to vector<16x16xbf16>
    %77 = vector.extract_strided_slice %1 {offsets = [0, 7, 0], sizes = [16, 1, 16], strides = [1, 1, 1]} : vector<16x8x16xbf16> to vector<16x1x16xbf16>
    %78 = vector.shape_cast %77 : vector<16x1x16xbf16> to vector<16x16xbf16>
    %79 = tpu.concatenate %76, %78 in 1 : vector<16x16xbf16>, vector<16x16xbf16> -> vector<16x32xbf16>
    %80 = tpu.concatenate %49, %54, %59, %64, %69, %74, %79 in 0 : vector<16x32xbf16>, vector<16x32xbf16>, vector<16x32xbf16>, vector<16x32xbf16>, vector<16x32xbf16>, vector<16x32xbf16>, vector<16x32xbf16> -> vector<112x32xbf16>
    %cst_11 = arith.constant dense<0.000000e+00> : vector<112x8xf32>
    %81 = tpu.matmul %80, %43, %cst_11 {dimension_numbers = #tpu.dot_dimension_numbers<[1], [0], [0], [1], [0, 0, 1, 1], [], []>} : vector<112x32xbf16>, vector<32x8xbf16>, vector<112x8xf32> -> vector<112x8xf32>
    %82 = vector.extract_strided_slice %81 {offsets = [0, 0], sizes = [16, 8], strides = [1, 1]} : vector<112x8xf32> to vector<16x8xf32>
    %83 = vector.extract_strided_slice %81 {offsets = [16, 0], sizes = [16, 8], strides = [1, 1]} : vector<112x8xf32> to vector<16x8xf32>
    %84 = arith.maximumf %82, %83 : vector<16x8xf32>
    %85 = vector.extract_strided_slice %81 {offsets = [32, 0], sizes = [16, 8], strides = [1, 1]} : vector<112x8xf32> to vector<16x8xf32>
    %86 = arith.maximumf %84, %85 : vector<16x8xf32>
    %87 = vector.extract_strided_slice %81 {offsets = [48, 0], sizes = [16, 8], strides = [1, 1]} : vector<112x8xf32> to vector<16x8xf32>
    %88 = arith.maximumf %86, %87 : vector<16x8xf32>
    %89 = vector.extract_strided_slice %81 {offsets = [64, 0], sizes = [16, 8], strides = [1, 1]} : vector<112x8xf32> to vector<16x8xf32>
    %90 = arith.maximumf %88, %89 : vector<16x8xf32>
    %91 = vector.extract_strided_slice %81 {offsets = [80, 0], sizes = [16, 8], strides = [1, 1]} : vector<112x8xf32> to vector<16x8xf32>
    %92 = arith.maximumf %90, %91 : vector<16x8xf32>
    %93 = vector.extract_strided_slice %81 {offsets = [96, 0], sizes = [16, 8], strides = [1, 1]} : vector<112x8xf32> to vector<16x8xf32>
    %94 = arith.maximumf %92, %93 : vector<16x8xf32>
    %95 = vector.broadcast %44 : vector<1x8xf32> to vector<16x8xf32>
    %96 = arith.addf %94, %95 : vector<16x8xf32>
    %cst_12 = arith.constant 0.000000e+00 : f32
    %97 = vector.broadcast %cst_12 : f32 to vector<16x8xf32>
    %98 = arith.maximumf %96, %97 : vector<16x8xf32>
    %c0_13 = arith.constant 0 : index
    %c0_14 = arith.constant 0 : index
    %99 = vector.load %arg7[%c0_13, %c0_14] : memref<48x16xf32, #tpu.memory_space<vmem>>, vector<48x16xf32>
    %100 = arith.truncf %99 : vector<48x16xf32> to vector<48x16xbf16>
    %c0_15 = arith.constant 0 : index
    %c0_16 = arith.constant 0 : index
    %101 = vector.load %arg8[%c0_15, %c0_16] : memref<1x16xf32, #tpu.memory_space<vmem>>, vector<1x16xf32>
    %102 = vector.extract_strided_slice %1 {offsets = [0, 0, 0], sizes = [16, 1, 16], strides = [1, 1, 1]} : vector<16x8x16xbf16> to vector<16x1x16xbf16>
    %103 = vector.shape_cast %102 : vector<16x1x16xbf16> to vector<16x16xbf16>
    %104 = vector.extract_strided_slice %1 {offsets = [0, 1, 0], sizes = [16, 1, 16], strides = [1, 1, 1]} : vector<16x8x16xbf16> to vector<16x1x16xbf16>
    %105 = vector.shape_cast %104 : vector<16x1x16xbf16> to vector<16x16xbf16>
    %106 = vector.extract_strided_slice %1 {offsets = [0, 2, 0], sizes = [16, 1, 16], strides = [1, 1, 1]} : vector<16x8x16xbf16> to vector<16x1x16xbf16>
    %107 = vector.shape_cast %106 : vector<16x1x16xbf16> to vector<16x16xbf16>
    %108 = tpu.concatenate %103, %105, %107 in 1 : vector<16x16xbf16>, vector<16x16xbf16>, vector<16x16xbf16> -> vector<16x48xbf16>
    %109 = vector.extract_strided_slice %1 {offsets = [0, 1, 0], sizes = [16, 1, 16], strides = [1, 1, 1]} : vector<16x8x16xbf16> to vector<16x1x16xbf16>
    %110 = vector.shape_cast %109 : vector<16x1x16xbf16> to vector<16x16xbf16>
    %111 = vector.extract_strided_slice %1 {offsets = [0, 2, 0], sizes = [16, 1, 16], strides = [1, 1, 1]} : vector<16x8x16xbf16> to vector<16x1x16xbf16>
    %112 = vector.shape_cast %111 : vector<16x1x16xbf16> to vector<16x16xbf16>
    %113 = vector.extract_strided_slice %1 {offsets = [0, 3, 0], sizes = [16, 1, 16], strides = [1, 1, 1]} : vector<16x8x16xbf16> to vector<16x1x16xbf16>
    %114 = vector.shape_cast %113 : vector<16x1x16xbf16> to vector<16x16xbf16>
    %115 = tpu.concatenate %110, %112, %114 in 1 : vector<16x16xbf16>, vector<16x16xbf16>, vector<16x16xbf16> -> vector<16x48xbf16>
    %116 = vector.extract_strided_slice %1 {offsets = [0, 2, 0], sizes = [16, 1, 16], strides = [1, 1, 1]} : vector<16x8x16xbf16> to vector<16x1x16xbf16>
    %117 = vector.shape_cast %116 : vector<16x1x16xbf16> to vector<16x16xbf16>
    %118 = vector.extract_strided_slice %1 {offsets = [0, 3, 0], sizes = [16, 1, 16], strides = [1, 1, 1]} : vector<16x8x16xbf16> to vector<16x1x16xbf16>
    %119 = vector.shape_cast %118 : vector<16x1x16xbf16> to vector<16x16xbf16>
    %120 = vector.extract_strided_slice %1 {offsets = [0, 4, 0], sizes = [16, 1, 16], strides = [1, 1, 1]} : vector<16x8x16xbf16> to vector<16x1x16xbf16>
    %121 = vector.shape_cast %120 : vector<16x1x16xbf16> to vector<16x16xbf16>
    %122 = tpu.concatenate %117, %119, %121 in 1 : vector<16x16xbf16>, vector<16x16xbf16>, vector<16x16xbf16> -> vector<16x48xbf16>
    %123 = vector.extract_strided_slice %1 {offsets = [0, 3, 0], sizes = [16, 1, 16], strides = [1, 1, 1]} : vector<16x8x16xbf16> to vector<16x1x16xbf16>
    %124 = vector.shape_cast %123 : vector<16x1x16xbf16> to vector<16x16xbf16>
    %125 = vector.extract_strided_slice %1 {offsets = [0, 4, 0], sizes = [16, 1, 16], strides = [1, 1, 1]} : vector<16x8x16xbf16> to vector<16x1x16xbf16>
    %126 = vector.shape_cast %125 : vector<16x1x16xbf16> to vector<16x16xbf16>
    %127 = vector.extract_strided_slice %1 {offsets = [0, 5, 0], sizes = [16, 1, 16], strides = [1, 1, 1]} : vector<16x8x16xbf16> to vector<16x1x16xbf16>
    %128 = vector.shape_cast %127 : vector<16x1x16xbf16> to vector<16x16xbf16>
    %129 = tpu.concatenate %124, %126, %128 in 1 : vector<16x16xbf16>, vector<16x16xbf16>, vector<16x16xbf16> -> vector<16x48xbf16>
    %130 = vector.extract_strided_slice %1 {offsets = [0, 4, 0], sizes = [16, 1, 16], strides = [1, 1, 1]} : vector<16x8x16xbf16> to vector<16x1x16xbf16>
    %131 = vector.shape_cast %130 : vector<16x1x16xbf16> to vector<16x16xbf16>
    %132 = vector.extract_strided_slice %1 {offsets = [0, 5, 0], sizes = [16, 1, 16], strides = [1, 1, 1]} : vector<16x8x16xbf16> to vector<16x1x16xbf16>
    %133 = vector.shape_cast %132 : vector<16x1x16xbf16> to vector<16x16xbf16>
    %134 = vector.extract_strided_slice %1 {offsets = [0, 6, 0], sizes = [16, 1, 16], strides = [1, 1, 1]} : vector<16x8x16xbf16> to vector<16x1x16xbf16>
    %135 = vector.shape_cast %134 : vector<16x1x16xbf16> to vector<16x16xbf16>
    %136 = tpu.concatenate %131, %133, %135 in 1 : vector<16x16xbf16>, vector<16x16xbf16>, vector<16x16xbf16> -> vector<16x48xbf16>
    %137 = vector.extract_strided_slice %1 {offsets = [0, 5, 0], sizes = [16, 1, 16], strides = [1, 1, 1]} : vector<16x8x16xbf16> to vector<16x1x16xbf16>
    %138 = vector.shape_cast %137 : vector<16x1x16xbf16> to vector<16x16xbf16>
    %139 = vector.extract_strided_slice %1 {offsets = [0, 6, 0], sizes = [16, 1, 16], strides = [1, 1, 1]} : vector<16x8x16xbf16> to vector<16x1x16xbf16>
    %140 = vector.shape_cast %139 : vector<16x1x16xbf16> to vector<16x16xbf16>
    %141 = vector.extract_strided_slice %1 {offsets = [0, 7, 0], sizes = [16, 1, 16], strides = [1, 1, 1]} : vector<16x8x16xbf16> to vector<16x1x16xbf16>
    %142 = vector.shape_cast %141 : vector<16x1x16xbf16> to vector<16x16xbf16>
    %143 = tpu.concatenate %138, %140, %142 in 1 : vector<16x16xbf16>, vector<16x16xbf16>, vector<16x16xbf16> -> vector<16x48xbf16>
    %144 = tpu.concatenate %108, %115, %122, %129, %136, %143 in 0 : vector<16x48xbf16>, vector<16x48xbf16>, vector<16x48xbf16>, vector<16x48xbf16>, vector<16x48xbf16>, vector<16x48xbf16> -> vector<96x48xbf16>
    %cst_17 = arith.constant dense<0.000000e+00> : vector<96x16xf32>
    %145 = tpu.matmul %144, %100, %cst_17 {dimension_numbers = #tpu.dot_dimension_numbers<[1], [0], [0], [1], [0, 0, 1, 1], [], []>} : vector<96x48xbf16>, vector<48x16xbf16>, vector<96x16xf32> -> vector<96x16xf32>
    %146 = vector.extract_strided_slice %145 {offsets = [0, 0], sizes = [16, 16], strides = [1, 1]} : vector<96x16xf32> to vector<16x16xf32>
    %147 = vector.extract_strided_slice %145 {offsets = [16, 0], sizes = [16, 16], strides = [1, 1]} : vector<96x16xf32> to vector<16x16xf32>
    %148 = arith.maximumf %146, %147 : vector<16x16xf32>
    %149 = vector.extract_strided_slice %145 {offsets = [32, 0], sizes = [16, 16], strides = [1, 1]} : vector<96x16xf32> to vector<16x16xf32>
    %150 = arith.maximumf %148, %149 : vector<16x16xf32>
    %151 = vector.extract_strided_slice %145 {offsets = [48, 0], sizes = [16, 16], strides = [1, 1]} : vector<96x16xf32> to vector<16x16xf32>
    %152 = arith.maximumf %150, %151 : vector<16x16xf32>
    %153 = vector.extract_strided_slice %145 {offsets = [64, 0], sizes = [16, 16], strides = [1, 1]} : vector<96x16xf32> to vector<16x16xf32>
    %154 = arith.maximumf %152, %153 : vector<16x16xf32>
    %155 = vector.extract_strided_slice %145 {offsets = [80, 0], sizes = [16, 16], strides = [1, 1]} : vector<96x16xf32> to vector<16x16xf32>
    %156 = arith.maximumf %154, %155 : vector<16x16xf32>
    %157 = vector.broadcast %101 : vector<1x16xf32> to vector<16x16xf32>
    %158 = arith.addf %156, %157 : vector<16x16xf32>
    %cst_18 = arith.constant 0.000000e+00 : f32
    %159 = vector.broadcast %cst_18 : f32 to vector<16x16xf32>
    %160 = arith.maximumf %158, %159 : vector<16x16xf32>
    %161 = tpu.concatenate %41, %98, %160 in 1 : vector<16x8xf32>, vector<16x8xf32>, vector<16x16xf32> -> vector<16x32xf32>
    %c0_19 = arith.constant 0 : index
    %c0_20 = arith.constant 0 : index
    %162 = vector.load %arg9[%c0_19, %c0_20] : memref<32x32xf32, #tpu.memory_space<vmem>>, vector<32x32xf32>
    %163 = arith.truncf %162 : vector<32x32xf32> to vector<32x32xbf16>
    %c0_21 = arith.constant 0 : index
    %c0_22 = arith.constant 0 : index
    %164 = vector.load %arg10[%c0_21, %c0_22] : memref<1x32xf32, #tpu.memory_space<vmem>>, vector<1x32xf32>
    %c0_23 = arith.constant 0 : index
    %c0_24 = arith.constant 0 : index
    %165 = vector.load %arg11[%c0_23, %c0_24] : memref<32x32xf32, #tpu.memory_space<vmem>>, vector<32x32xf32>
    %166 = arith.truncf %165 : vector<32x32xf32> to vector<32x32xbf16>
    %c0_25 = arith.constant 0 : index
    %c0_26 = arith.constant 0 : index
    %167 = vector.load %arg12[%c0_25, %c0_26] : memref<1x32xf32, #tpu.memory_space<vmem>>, vector<1x32xf32>
    %168 = arith.truncf %161 : vector<16x32xf32> to vector<16x32xbf16>
    %cst_27 = arith.constant dense<0.000000e+00> : vector<16x32xf32>
    %169 = tpu.matmul %168, %163, %cst_27 {dimension_numbers = #tpu.dot_dimension_numbers<[1], [0], [0], [1], [0, 0, 1, 1], [], []>} : vector<16x32xbf16>, vector<32x32xbf16>, vector<16x32xf32> -> vector<16x32xf32>
    %170 = vector.broadcast %164 : vector<1x32xf32> to vector<16x32xf32>
    %171 = arith.addf %169, %170 : vector<16x32xf32>
    %cst_28 = arith.constant 0.000000e+00 : f32
    %172 = vector.broadcast %cst_28 : f32 to vector<16x32xf32>
    %173 = arith.maximumf %171, %172 : vector<16x32xf32>
    %cst_29 = arith.constant dense<0.000000e+00> : vector<16x32xf32>
    %174 = tpu.matmul %168, %166, %cst_29 {dimension_numbers = #tpu.dot_dimension_numbers<[1], [0], [0], [1], [0, 0, 1, 1], [], []>} : vector<16x32xbf16>, vector<32x32xbf16>, vector<16x32xf32> -> vector<16x32xf32>
    %175 = vector.broadcast %167 : vector<1x32xf32> to vector<16x32xf32>
    %176 = arith.addf %174, %175 : vector<16x32xf32>
    %177 = arith.negf %176 : vector<16x32xf32>
    %178 = math.exp %177 : vector<16x32xf32>
    %cst_30 = arith.constant 1.000000e+00 : f32
    %179 = vector.broadcast %cst_30 : f32 to vector<16x32xf32>
    %180 = arith.addf %179, %178 : vector<16x32xf32>
    %181 = arith.divf %179, %180 : vector<16x32xf32>
    %182 = arith.mulf %181, %161 : vector<16x32xf32>
    %cst_31 = arith.constant 1.000000e+00 : f32
    %183 = vector.broadcast %cst_31 : f32 to vector<16x32xf32>
    %184 = arith.subf %183, %181 : vector<16x32xf32>
    %185 = arith.mulf %184, %173 : vector<16x32xf32>
    %186 = arith.addf %182, %185 : vector<16x32xf32>
    %c0_32 = arith.constant 0 : index
    %c0_33 = arith.constant 0 : index
    %187 = vector.load %arg13[%c0_32, %c0_33] : memref<48x32xf32, #tpu.memory_space<vmem>>, vector<48x32xf32>
    %188 = arith.truncf %187 : vector<48x32xf32> to vector<48x32xbf16>
    %c0_34 = arith.constant 0 : index
    %c0_35 = arith.constant 0 : index
    %189 = vector.load %arg14[%c0_34, %c0_35] : memref<1x32xf32, #tpu.memory_space<vmem>>, vector<1x32xf32>
    %c0_36 = arith.constant 0 : index
    %c0_37 = arith.constant 0 : index
    %190 = vector.load %arg2[%c0_36, %c0_37] : memref<16x16xf32, #tpu.memory_space<vmem>>, vector<16x16xf32>
    %191 = tpu.concatenate %190, %186 in 1 : vector<16x16xf32>, vector<16x32xf32> -> vector<16x48xf32>
    %192 = arith.truncf %191 : vector<16x48xf32> to vector<16x48xbf16>
    %cst_38 = arith.constant dense<0.000000e+00> : vector<16x32xf32>
    %193 = tpu.matmul %192, %188, %cst_38 {dimension_numbers = #tpu.dot_dimension_numbers<[1], [0], [0], [1], [0, 0, 1, 1], [], []>} : vector<16x48xbf16>, vector<48x32xbf16>, vector<16x32xf32> -> vector<16x32xf32>
    %194 = vector.broadcast %189 : vector<1x32xf32> to vector<16x32xf32>
    %195 = arith.addf %193, %194 : vector<16x32xf32>
    %c0_39 = arith.constant 0 : index
    %c0_40 = arith.constant 0 : index
    %196 = vector.load %arg15[%c0_39, %c0_40] : memref<16x32xf32, #tpu.memory_space<vmem>>, vector<16x32xf32>
    tpu.vector_store %arg15[%c0_39, %c0_40], %195 {strides = array<i32>} : memref<16x32xf32, #tpu.memory_space<vmem>>, vector<16x32xf32>,
    return
  }
  func.func @transform_0(%arg0: i32) -> (i32, i32, i32) {
    %c0_i32 = arith.constant 0 : i32
    %c0_i32_0 = arith.constant 0 : i32
    %c0_i32_1 = arith.constant 0 : i32
    return %arg0, %c0_i32, %c0_i32_0 : i32, i32, i32
  }
  func.func @transform_1(%arg0: i32) -> (i32, i32) {
    %c0_i32 = arith.constant 0 : i32
    %c0_i32_0 = arith.constant 0 : i32
    return %arg0, %c0_i32 : i32, i32
  }
  func.func @transform_2(%arg0: i32) -> (i32, i32) {
    %c0_i32 = arith.constant 0 : i32
    %c0_i32_0 = arith.constant 0 : i32
    %c0_i32_1 = arith.constant 0 : i32
    return %c0_i32, %c0_i32_0 : i32, i32
  }
  func.func @transform_3(%arg0: i32) -> (i32, i32) {
    %c0_i32 = arith.constant 0 : i32
    %c0_i32_0 = arith.constant 0 : i32
    %c0_i32_1 = arith.constant 0 : i32
    return %c0_i32, %c0_i32_0 : i32, i32
  }
  func.func @transform_4(%arg0: i32) -> (i32, i32) {
    %c0_i32 = arith.constant 0 : i32
    %c0_i32_0 = arith.constant 0 : i32
    %c0_i32_1 = arith.constant 0 : i32
    return %c0_i32, %c0_i32_0 : i32, i32
  }
  func.func @transform_5(%arg0: i32) -> (i32, i32) {
    %c0_i32 = arith.constant 0 : i32
    %c0_i32_0 = arith.constant 0 : i32
    %c0_i32_1 = arith.constant 0 : i32
    return %c0_i32, %c0_i32_0 : i32, i32
  }
  func.func @transform_6(%arg0: i32) -> (i32, i32) {
    %c0_i32 = arith.constant 0 : i32
    %c0_i32_0 = arith.constant 0 : i32
    %c0_i32_1 = arith.constant 0 : i32
    return %c0_i32, %c0_i32_0 : i32, i32
  }
  func.func @transform_7(%arg0: i32) -> (i32, i32) {
    %c0_i32 = arith.constant 0 : i32
    %c0_i32_0 = arith.constant 0 : i32
    %c0_i32_1 = arith.constant 0 : i32
    return %c0_i32, %c0_i32_0 : i32, i32
  }
  func.func @transform_8(%arg0: i32) -> (i32, i32) {
    %c0_i32 = arith.constant 0 : i32
    %c0_i32_0 = arith.constant 0 : i32
    %c0_i32_1 = arith.constant 0 : i32
    return %c0_i32, %c0_i32_0 : i32, i32
  }
  func.func @transform_9(%arg0: i32) -> (i32, i32) {
    %c0_i32 = arith.constant 0 : i32
    %c0_i32_0 = arith.constant 0 : i32
    %c0_i32_1 = arith.constant 0 : i32
    return %c0_i32, %c0_i32_0 : i32, i32
  }
  func.func @transform_10(%arg0: i32) -> (i32, i32) {
    %c0_i32 = arith.constant 0 : i32
    %c0_i32_0 = arith.constant 0 : i32
    %c0_i32_1 = arith.constant 0 : i32
    return %c0_i32, %c0_i32_0 : i32, i32
  }
  func.func @transform_11(%arg0: i32) -> (i32, i32) {
    %c0_i32 = arith.constant 0 : i32
    %c0_i32_0 = arith.constant 0 : i32
    %c0_i32_1 = arith.constant 0 : i32
    return %c0_i32, %c0_i32_0 : i32, i32
  }
  func.func @transform_12(%arg0: i32) -> (i32, i32) {
    %c0_i32 = arith.constant 0 : i32
    %c0_i32_0 = arith.constant 0 : i32
    %c0_i32_1 = arith.constant 0 : i32
    return %c0_i32, %c0_i32_0 : i32, i32
  }
  func.func @transform_13(%arg0: i32) -> (i32, i32) {
    %c0_i32 = arith.constant 0 : i32
    %c0_i32_0 = arith.constant 0 : i32
    %c0_i32_1 = arith.constant 0 : i32
    return %c0_i32, %c0_i32_0 : i32, i32
  }
  func.func @transform_14(%arg0: i32) -> (i32, i32) {
    %c0_i32 = arith.constant 0 : i32
    %c0_i32_0 = arith.constant 0 : i32
    return %arg0, %c0_i32 : i32, i32
  }
}

</mosaic_0001>

<bundles_post_ra>
// kernel: tpu_custom_call.1
= control target key start
LH: loop header
LB: loop body
LE: loop exit
PB: predicated region body
PF: predicated region fallthrough
CT: control target
= control target key end

     0   :  { %19 = vsyncpa [#allocation3], 0  ;;  %s3123_s0 = inlined_call_operand.vmem [shape: f32[16,8,16], index: 0, kind: input, shape index: {}]   ;;  %s3124_s1 = inlined_call_operand.hbm [shape: f32[16,16], index: 1, kind: input, shape index: {}]   ;;  %s3125_s2 = inlined_call_operand.vmem [shape: f32[16,8], index: 2, kind: input, shape index: {}]   ;;  %s3126_s3 = inlined_call_operand.vmem [shape: f32[1,8], index: 3, kind: input, shape index: {}]   ;;  %s3127_s4 = inlined_call_operand.vmem [shape: f32[32,8], index: 4, kind: input, shape index: {}]   ;;  %s3128_s5 = inlined_call_operand.vmem [shape: f32[1,8], index: 5, kind: input, shape index: {}]   ;;  %s3129_s6 = inlined_call_operand.vmem [shape: f32[48,16], index: 6, kind: input, shape index: {}]   ;;  %s3130_s7 = inlined_call_operand.vmem [shape: f32[1,16], index: 7, kind: input, shape index: {}]   ;;  %s3131_s8 = inlined_call_operand.vmem [shape: f32[32,32], index: 8, kind: input, shape index: {}]   ;;  %s3132_s9 = inlined_call_operand.vmem [shape: f32[1,32], index: 9, kind: input, shape index: {}]   ;;  %s3133_s10 = inlined_call_operand.vmem [shape: f32[32,32], index: 10, kind: input, shape index: {}]   ;;  %s3134_s11 = inlined_call_operand.vmem [shape: f32[1,32], index: 11, kind: input, shape index: {}]   ;;  %s3135_s12 = inlined_call_operand.vmem [shape: f32[48,32], index: 12, kind: input, shape index: {}]   ;;  %s3136_s13 = inlined_call_operand.vmem [shape: f32[1,32], index: 13, kind: input, shape index: {}]   ;;  %s3137_s14 = inlined_call_operand.hbm [shape: f32[16,32], index: 14, kind: output, shape index: {}]  }
   0x1   :  { %20 = vsyncpa [#allocation4], 0  ;;  %s1737_s29 = smov [#allocation2]   ;;  %s1689_s17 = scalar_lea.hbm %s3124_s1, 256 }
   0x2   :  { %s28_s30 = sshll.u32 %s1737_s29, 4  ;;  %p1690_p0 = scmp.ne.s32.totalorder %s3124_s1, %s1689_s17  ;;  %s29_s30 = int_to_ptr.vmem [resolvable:$true] %s28_s30 }
   0x3   :  { %p1693_p1 = scmp.lt.u32.totalorder %s1689_s17, %s3124_s1 }
   0x5   :  { %p1695_p2 = pnand %p1693_p1, %p1690_p0 }
   0x7   :  { %1698 = shalt.err (!%p1695_p2)
}
   0x8   :  { %s1699_s22 = scalar_lea.vmem %s29_s30, 256  ;;  %p1704_p4 = scmp.lt.s32.totalorder %s29_s30, %s29_s30 }
   0x9   :  { %p1700_p3 = scmp.ne.s32.totalorder %s29_s30, %s1699_s22  ;;  %p1705_p5 = scmp.lt.s32.totalorder %s1699_s22, %s1699_s22 }
   0xb   :  { %p1706_p6 = por %p1705_p5, %p1704_p4 }
   0xd   :  { %p1707_p7 = pnand %p1706_p6, %p1700_p3 }
   0xf   :  { %1710 = shalt.err (!%p1707_p7)
}
  0x10   :  { %s1738_s23 = smov 128   ;;  %s1739_s24 = smov 8  }
  0x11   :  { %34 = dma.hbm_to_vmem [thread:$0]  %s3124_s1, 256, %s29_s30, [#allocation3], %s1738_s23, %s1738_s23, %s1739_s24  }
  0x12   :  { %1733 = dma.done.wait [#allocation3], 256  }
  0x13   :  { %1734 = vsyncadd [#allocation3], 4294967040  ;;  %v3138_v0 = vmov 0.0   ;;  %v78_v1 = vld [vmem:[%s3123_s0 + $0x78] sm:$0xff]  ;;  %v63_v2 = vld [vmem:[%s3123_s0] sm:$0xff]  ;;  %vm138_vm0 = vcmask 1043459  }
  0x14   :  { %1592 = vmatprep.subr.bf16.mxu1 %v3138_v0  ;;  %v64_v3 = vld [vmem:[%s3123_s0 + $0x8] sm:$0xff]  ;;  %v94_v4 = vpack.c.bf16 %v78_v1, %v78_v1  ;;  %v65_v5 = vld [vmem:[%s3123_s0 + $0x10] sm:$0xff]  ;;  %v66_v6 = vld [vmem:[%s3123_s0 + $0x18] sm:$0xff]  ;;  %v79_v8 = vpack.c.bf16 %v63_v2, %v63_v2  ;;  %vm132_vm1 = vcmask 1041409   ;;  %vm141_vm2 = vcmask 1044484   ;;  %s1741_s27 = smov 16  }
  0x15   :  { %v67_v7 = vld [vmem:[%s3123_s0 + $0x20] sm:$0xff]  ;;  %v68_v9 = vld [vmem:[%s3123_s0 + $0x28] sm:$0xff]  ;;  %v69_v10 = vld [vmem:[%s3123_s0 + $0x30] sm:$0xff]  ;;  %v80_v12 = vpack.c.bf16 %v64_v3, %v64_v3  ;;  %v81_v13 = vpack.c.bf16 %v65_v5, %v65_v5  ;;  %v82_v14 = vpack.c.bf16 %v66_v6, %v66_v6  ;;  %vm135_vm3 = vcmask 1042434   ;;  %s1744_s17 = smov [#allocation5]  }
  0x16   :  { %v70_v11 = vld [vmem:[%s3123_s0 + $0x38] sm:$0xff]  ;;  %v83_v15 = vpack.c.bf16 %v67_v7, %v67_v7  ;;  %v1863_v16 = vunpack.c.l.b16 %v94_v4  ;;  %v71_v17 = vld [vmem:[%s3123_s0 + $0x40] sm:$0xff]  ;;  %v72_v18 = vld [vmem:[%s3123_s0 + $0x48] sm:$0xff]  ;;  %v84_v20 = vpack.c.bf16 %v68_v9, %v68_v9  ;;  %v85_v21 = vpack.c.bf16 %v69_v10, %v69_v10  ;;  %s1493_s18 = sshll.u32 %s1744_s17, 4  ;;  %s1494_s18 = int_to_ptr.vmem [resolvable:$true] %s1493_s18 }
  0x17   :  { %v73_v19 = vld [vmem:[%s3123_s0 + $0x50] sm:$0xff]  ;;  %v86_v22 = vpack.c.bf16 %v70_v11, %v70_v11  ;;  %vm144_vm4 = vcmask 1045509   ;;  %v74_v23 = vld [vmem:[%s3123_s0 + $0x58] sm:$0xff]  ;;  %v75_v24 = vld [vmem:[%s3123_s0 + $0x60] sm:$0xff]  ;;  %v87_v26 = vpack.c.bf16 %v71_v17, %v71_v17  ;;  %v88_v27 = vpack.c.bf16 %v72_v18, %v72_v18  ;;  %p1716_p9 = scmp.lt.s32.totalorder %s1494_s18, %s1494_s18 }
  0x18   :  { %v76_v25 = vld [vmem:[%s3123_s0 + $0x68] sm:$0xff]  ;;  %v89_v28 = vpack.c.bf16 %v73_v19, %v73_v19  ;;  %v1883_v29 = vunpack.c.l.b16 %v79_v8  ;;  %vm147_vm5 = vcmask 1046534   ;;  %v1886_v30 = vrot.slane %v1863_v16, 2  ;;  %v77_v50 = vld [vmem:[%s3123_s0 + $0x70] sm:$0xff]  ;;  %s1742_s0 = smov 32  }
  0x19   :  { %v90_v31 = vpack.c.bf16 %v74_v23, %v74_v23  ;;  %v91_v32 = vpack.c.bf16 %v75_v24, %v75_v24  ;;  %v92_v33 = vpack.c.bf16 %v76_v25, %v76_v25  ;;  %vm150_vm6 = vcmask 1047559  }
  0x1a   :  { %v1888_v34 = vunpack.c.l.b16 %v80_v12  ;;  %v1890_v35 = vunpack.c.l.b16 %v81_v13  ;;  %v1892_v36 = vunpack.c.l.b16 %v82_v14  ;;  %v1894_v37 = vunpack.c.l.b16 %v83_v15 }
  0x1b   :  { %v556_v38 = vpack.c.b16 %v1886_v30, %v1886_v30  ;;  %v1898_v39 = vunpack.c.l.b16 %v84_v20  ;;  %v1900_v40 = vunpack.c.l.b16 %v85_v21  ;;  %v1902_v41 = vunpack.c.l.b16 %v86_v22 }
  0x1c   :  { %v1904_v42 = vunpack.c.l.b16 %v87_v26  ;;  %v1906_v43 = vunpack.c.l.b16 %v88_v27  ;;  %v1908_v44 = vunpack.c.l.b16 %v89_v28  ;;  %v1910_v45 = vunpack.c.l.b16 %v90_v31 }
  0x1d   :  { %559 = vrot.lane.b32.xlu1 %v556_v38, %s1741_s27  ;;  %v1913_v46 = vunpack.c.l.b16 %v91_v32  ;;  %v1915_v47 = vunpack.c.l.b16 %v92_v33  ;;  %v1918_v48 = vrot.slane %v1883_v29, 1  ;;  %v1921_v49 = vrot.slane %v1890_v35, 7 }
  0x1e   :  { %v1927_v51 = vrot.slane %v1892_v36, 6  ;;  %v1930_v52 = vrot.slane %v1894_v37, 5  ;;  %v1933_v53 = vrot.slane %v1898_v39, 4  ;;  %v1936_v54 = vrot.slane %v1900_v40, 3 }
  0x1f   :  { %v1939_v55 = vrot.slane %v1902_v41, 2  ;;  %v1942_v56 = vrot.slane %v1904_v42, 1  ;;  %v1945_v57 = vrot.slane %v1908_v44, 7  ;;  %v1948_v58 = vrot.slane %v1910_v45, 6 }
  0x20   :  { %v1951_v59 = vrot.slane %v1913_v46, 5  ;;  %v1954_v60 = vrot.slane %v1915_v47, 4  ;;  %v582_v61 = vsel %vm138_vm0, %v1888_v34, %v1918_v48  ;;  %v93_v62 = vpack.c.bf16 %v77_v50, %v77_v50 }
  0x21   :  { %v583_v63 = vsel %vm141_vm2, %v1921_v49, %v582_v61  ;;  %v587_v1 = vsel %vm132_vm1, %v1939_v55, %v1936_v54  ;;  %v168_v2 = vsel %vm132_vm1, %v1888_v34, %v1918_v48  ;;  %v182_v3 = vsel %vm132_vm1, %v1906_v43, %v1942_v56 }
  0x22   :  { %v584_v4 = vsel %vm144_vm4, %v1927_v51, %v583_v63  ;;  %v588_v5 = vsel %vm135_vm3, %v1942_v56, %v587_v1  ;;  %v1974_v6 = vunpack.c.l.b16 %v93_v62  ;;  %v170_v7 = vsel %vm135_vm3, %v1921_v49, %v168_v2 }
  0x23   :  { %v585_v8 = vsel %vm147_vm5, %v1930_v52, %v584_v4  ;;  %v589_v9 = vsel %vm138_vm0, %v1906_v43, %v588_v5  ;;  %v172_v10 = vsel %vm138_vm0, %v1927_v51, %v170_v7  ;;  %v184_v11 = vsel %vm135_vm3, %v1945_v57, %v182_v3 }
  0x24   :  { %v586_v12 = vsel %vm150_vm6, %v1933_v53, %v585_v8  ;;  %v590_v13 = vsel %vm141_vm2, %v1945_v57, %v589_v9  ;;  %v174_v14 = vsel %vm141_vm2, %v1930_v52, %v172_v10  ;;  %v186_v15 = vsel %vm138_vm0, %v1948_v58, %v184_v11 }
  0x25   :  { %v591_v17 = vsel %vm144_vm4, %v1948_v58, %v590_v13  ;;  %v176_v18 = vsel %vm144_vm4, %v1933_v53, %v174_v14  ;;  %v188_v19 = vsel %vm141_vm2, %v1951_v59, %v186_v15  ;;  %v2001_v20 = vrot.slane %v1974_v6, 3 }
  0x26   :  { %v592_v21 = vsel %vm147_vm5, %v1951_v59, %v591_v17  ;;  %v178_v22 = vsel %vm147_vm5, %v1936_v54, %v176_v18  ;;  %v190_v23 = vsel %vm144_vm4, %v1954_v60, %v188_v19  ;;  %v622_v24 = vsel %vm141_vm2, %v1888_v34, %v1918_v48 }
  0x27   :  { %v593_v25 = vsel %vm150_vm6, %v1954_v60, %v592_v21  ;;  %v180_v26 = vsel %vm150_vm6, %v1939_v55, %v178_v22  ;;  %v192_v27 = vsel %vm147_vm5, %v2001_v20, %v190_v23  ;;  %v623_v28 = vsel %vm144_vm4, %v1921_v49, %v622_v24 }
  0x28   :  { %v595_v31 = vpack.c.b16 %v593_v25, %v586_v12  ;;  %v194_v32 = vsel %vm150_vm6, %v1886_v30, %v192_v27  ;;  %v624_v33 = vsel %vm147_vm5, %v1927_v51, %v623_v28  ;;  %v626_v38 = vsel %vm132_vm1, %v1936_v54, %v1933_v53 }
  0x29   :  { %v2027_v50 = vpack.c.b16 %v194_v32, %v180_v26  ;;  %v625_v61 = vsel %vm150_vm6, %v1930_v52, %v624_v33  ;;  %v627_v62 = vsel %vm135_vm3, %v1939_v55, %v626_v38  ;;  %v542_v63 = vsel %vm135_vm3, %v1888_v34, %v1918_v48 }
  0x2a   :  { %597 = vrot.lane.b32.xlu1 %v595_v31, %s1741_s27  ;;  %v628_v1 = vsel %vm138_vm0, %v1942_v56, %v627_v62  ;;  %v543_v2 = vsel %vm138_vm0, %v1921_v49, %v542_v63  ;;  %v548_v3 = vsel %vm132_vm1, %v1942_v56, %v1939_v55  ;;  %v2045_v4 = vrot.slane %v1883_v29, 2 }
  0x2b   :  { %523 = vrot.lane.b32.xlu0 %v2027_v50, %s1741_s27  ;;  %v629_v5 = vsel %vm141_vm2, %v1906_v43, %v628_v1  ;;  %v544_v7 = vsel %vm141_vm2, %v1927_v51, %v543_v2  ;;  %v549_v8 = vsel %vm135_vm3, %v1906_v43, %v548_v3  ;;  %v2056_v9 = vrot.slane %v1888_v34, 1 }
  0x2c   :  { %v630_v10 = vsel %vm144_vm4, %v1945_v57, %v629_v5  ;;  %v545_v11 = vsel %vm144_vm4, %v1930_v52, %v544_v7  ;;  %v550_v12 = vsel %vm138_vm0, %v1945_v57, %v549_v8  ;;  %v2065_v13 = vrot.slane %v1892_v36, 7 }
  0x2d   :  { %v631_v14 = vsel %vm147_vm5, %v1948_v58, %v630_v10  ;;  %v546_v15 = vsel %vm147_vm5, %v1933_v53, %v545_v11  ;;  %v551_v17 = vsel %vm141_vm2, %v1948_v58, %v550_v12  ;;  %v2074_v18 = vrot.slane %v1894_v37, 6 }
  0x2e   :  { %v632_v19 = vsel %vm150_vm6, %v1951_v59, %v631_v14  ;;  %v547_v21 = vsel %vm150_vm6, %v1936_v54, %v546_v15  ;;  %v552_v22 = vsel %vm144_vm4, %v1951_v59, %v551_v17  ;;  %v2083_v23 = vrot.slane %v1898_v39, 5 }
  0x2f   :  { %v635_v24 = vpack.c.b16 %v632_v19, %v625_v61  ;;  %v553_v25 = vsel %vm147_vm5, %v1954_v60, %v552_v22  ;;  %v2088_v26 = vrot.slane %v1900_v40, 4  ;;  %v2091_v27 = vrot.slane %v1902_v41, 3 }
  0x30   :  { %v554_v28 = vsel %vm150_vm6, %v2001_v20, %v553_v25  ;;  %v2096_v31 = vrot.slane %v1904_v42, 2  ;;  %v2099_v32 = vrot.slane %v1906_v43, 1  ;;  %v2102_v33 = vrot.slane %v1910_v45, 7 }
  0x31   :  { %637 = vrot.lane.b32.xlu1 %v635_v24, %s1741_s27  ;;  %v555_v38 = vpack.c.b16 %v554_v28, %v547_v21  ;;  %v2106_v61 = vrot.slane %v1913_v46, 6  ;;  %v2109_v62 = vrot.slane %v1915_v47, 5  ;;  %v2112_v63 = vrot.slane %v1974_v6, 4 }
  0x32   :  { %v974_v1 = vsel %vm135_vm3, %v2056_v9, %v2045_v4  ;;  %v980_v2 = vsel %vm132_vm1, %v2096_v31, %v2091_v27  ;;  %v594_v3 = vsel %vm132_vm1, %v1886_v30, %v2001_v20  ;;  %v662_v5 = vsel %vm144_vm4, %v1888_v34, %v1918_v48 }
  0x33   :  { %557 = vrot.lane.b32.xlu0 %v555_v38, %s1741_s27  ;;  %v975_v7 = vsel %vm138_vm0, %v1890_v35, %v974_v1  ;;  %v981_v8 = vsel %vm135_vm3, %v2099_v32, %v980_v2  ;;  %v596_v10 = vpack.c.b16 %v594_v3, %v594_v3  ;;  %v663_v11 = vsel %vm147_vm5, %v1921_v49, %v662_v5 }
  0x34   :  { %v976_v12 = vsel %vm141_vm2, %v2065_v13, %v975_v7  ;;  %v982_v14 = vsel %vm138_vm0, %v1908_v44, %v981_v8  ;;  %v664_v15 = vsel %vm150_vm6, %v1927_v51, %v663_v11  ;;  %v665_v17 = vsel %vm132_vm1, %v1933_v53, %v1930_v52 }
  0x35   :  { %v977_v19 = vsel %vm144_vm4, %v2074_v18, %v976_v12  ;;  %v983_v21 = vsel %vm141_vm2, %v2102_v33, %v982_v14  ;;  %v666_v22 = vsel %vm135_vm3, %v1936_v54, %v665_v17  ;;  %v633_v24 = vsel %vm132_vm1, %v2001_v20, %v1954_v60 }
  0x36   :  { %v978_v25 = vsel %vm147_vm5, %v2083_v23, %v977_v19  ;;  %v984_v28 = vsel %vm144_vm4, %v2106_v61, %v983_v21  ;;  %v667_v38 = vsel %vm138_vm0, %v1939_v55, %v666_v22  ;;  %v634_v1 = vsel %vm135_vm3, %v1886_v30, %v633_v24 }
  0x37   :  { %v979_v2 = vsel %vm150_vm6, %v2088_v26, %v978_v25  ;;  %v985_v3 = vsel %vm147_vm5, %v2109_v62, %v984_v28  ;;  %599 = vrot.lane.b32.xlu0 %v596_v10, %s1741_s27  ;;  %v668_v5 = vsel %vm141_vm2, %v1942_v56, %v667_v38  ;;  %v636_v7 = vpack.c.b16 %v634_v1, %v634_v1 }
  0x38   :  { %v986_v8 = vsel %vm150_vm6, %v2112_v63, %v985_v3  ;;  %v669_v11 = vsel %vm144_vm4, %v1906_v43, %v668_v5  ;;  %v198_v12 = vsel %vm132_vm1, %v2056_v9, %v2045_v4  ;;  %v212_v14 = vsel %vm132_vm1, %v2099_v32, %v2096_v31 }
  0x39   :  { %v987_v17 = vpack.c.b16 %v986_v8, %v979_v2  ;;  %v670_v10 = vsel %vm147_vm5, %v1945_v57, %v669_v11  ;;  %v199_v19 = vsel %vm135_vm3, %v1890_v35, %v198_v12  ;;  %v213_v21 = vsel %vm135_vm3, %v1908_v44, %v212_v14 }
  0x3a   :  { %v671_v22 = vsel %vm150_vm6, %v1948_v58, %v670_v10  ;;  %v201_v24 = vsel %vm138_vm0, %v2065_v13, %v199_v19  ;;  %v215_v25 = vsel %vm138_vm0, %v2102_v33, %v213_v21  ;;  %v2189_v28 = vrot.slane %v1863_v16, 3 }
  0x3b   :  { %989 = vrot.lane.b32.xlu1 %v987_v17, %s1742_s0  ;;  %v675_v38 = vpack.c.b16 %v671_v22, %v664_v15  ;;  %639 = vrot.lane.b32.xlu0 %v636_v7, %s1741_s27  ;;  %v203_v1 = vsel %vm141_vm2, %v2074_v18, %v201_v24  ;;  %v217_v2 = vsel %vm141_vm2, %v2106_v61, %v215_v25  ;;  %v2198_v3 = vrot.slane %v1888_v34, 7 }
  0x3c   :  { %v205_v5 = vsel %vm144_vm4, %v2083_v23, %v203_v1  ;;  %v219_v8 = vsel %vm144_vm4, %v2109_v62, %v217_v2  ;;  %v988_v15 = vpack.c.b16 %v2189_v28, %v2189_v28  ;;  %v1031_v7 = vsel %vm132_vm1, %v2112_v63, %v2109_v62 }
  0x3d   :  { %v207_v11 = vsel %vm147_vm5, %v2088_v26, %v205_v5  ;;  %v221_v12 = vsel %vm147_vm5, %v2112_v63, %v219_v8  ;;  %v1032_v14 = vsel %vm135_vm3, %v2189_v28, %v1031_v7  ;;  %v672_v17 = vsel %vm132_vm1, %v1954_v60, %v1951_v59 }
  0x3e   :  { %v209_v10 = vsel %vm150_vm6, %v2091_v27, %v207_v11  ;;  %v223_v19 = vsel %vm150_vm6, %v2189_v28, %v221_v12  ;;  %v1034_v21 = vpack.c.b16 %v1032_v14, %v1032_v14  ;;  %v673_v22 = vsel %vm135_vm3, %v2001_v20, %v672_v17 }
  0x3f   :  { %677 = vrot.lane.b32.xlu1 %v675_v38, %s1741_s27  ;;  %v2225_v24 = vpack.c.b16 %v223_v19, %v209_v10  ;;  %991 = vrot.lane.b32.xlu0 %v988_v15, %s1742_s0  ;;  %v674_v25 = vsel %vm138_vm0, %v1886_v30, %v673_v22  ;;  %v711_v1 = vsel %vm132_vm1, %v1951_v59, %v1948_v58  ;;  %v2234_v2 = vrot.slane %v1890_v35, 6 }
  0x40   :  { %v676_v5 = vpack.c.b16 %v674_v25, %v674_v25  ;;  %v712_v8 = vsel %vm135_vm3, %v1954_v60, %v711_v1  ;;  %v1020_v38 = vsel %vm141_vm2, %v2056_v9, %v2045_v4  ;;  %v1024_v15 = vsel %vm132_vm1, %v2088_v26, %v2083_v23 }
  0x41   :  { %3141 = vst [vmem:[#allocation8_spill] sm:$0xff] %v2225_v24  ;;  %v713_v7 = vsel %vm138_vm0, %v2001_v20, %v712_v8  ;;  %v1021_v11 = vsel %vm144_vm4, %v1890_v35, %v1020_v38  ;;  %v1025_v12 = vsel %vm135_vm3, %v2091_v27, %v1024_v15  ;;  %v1009_v14 = vsel %vm132_vm1, %v2189_v28, %v2112_v63 }
  0x42   :  { %v714_v17 = vsel %vm141_vm2, %v1886_v30, %v713_v7  ;;  %v1022_v10 = vsel %vm147_vm5, %v2065_v13, %v1021_v11  ;;  %v1026_v19 = vsel %vm138_vm0, %v2096_v31, %v1025_v12  ;;  %v1011_v22 = vpack.c.b16 %v1009_v14, %v1009_v14 }
  0x43   :  { %970 = vrot.lane.b32.xlu1 %v2225_v24, %s1742_s0  ;;  %679 = vrot.lane.b32.xlu0 %v676_v5, %s1741_s27  ;;  %v716_v25 = vpack.c.b16 %v714_v17, %v714_v17  ;;  %v1023_v1 = vsel %vm150_vm6, %v2074_v18, %v1022_v10  ;;  %v1027_v8 = vsel %vm141_vm2, %v2099_v32, %v1026_v19  ;;  %v2267_v38 = vrot.slane %v1892_v36, 5 }
  0x44   :  { %v1028_v15 = vsel %vm144_vm4, %v1908_v44, %v1027_v8  ;;  %v702_v7 = vsel %vm147_vm5, %v1888_v34, %v1918_v48  ;;  %v704_v5 = vsel %vm132_vm1, %v1930_v52, %v1927_v51  ;;  %v1075_v11 = vsel %vm132_vm1, %v2106_v61, %v2102_v33 }
  0x45   :  { %v1029_v12 = vsel %vm147_vm5, %v2102_v33, %v1028_v15  ;;  %v703_v14 = vsel %vm150_vm6, %v1921_v49, %v702_v7  ;;  %v705_v17 = vsel %vm135_vm3, %v1933_v53, %v704_v5  ;;  %v1076_v10 = vsel %vm135_vm3, %v2109_v62, %v1075_v11 }
  0x46   :  { %v1030_v19 = vsel %vm150_vm6, %v2106_v61, %v1029_v12  ;;  %v706_v8 = vsel %vm138_vm0, %v1936_v54, %v705_v17  ;;  %v1077_v0 = vsel %vm138_vm0, %v2112_v63, %v1076_v10  ;;  %v997_v15 = vsel %vm138_vm0, %v2056_v9, %v2045_v4 }
  0x47   :  { %1037 = vrot.lane.b32.xlu1 %v1034_v21, %s1742_s0  ;;  %v1033_v7 = vpack.c.b16 %v1030_v19, %v1023_v1  ;;  %v707_v5 = vsel %vm141_vm2, %v1939_v55, %v706_v8  ;;  %v1078_v11 = vsel %vm141_vm2, %v2189_v28, %v1077_v0  ;;  %v998_v12 = vsel %vm141_vm2, %v1890_v35, %v997_v15 }
  0x48   :  { %v708_v17 = vsel %vm144_vm4, %v1942_v56, %v707_v5  ;;  %v1080_v10 = vpack.c.b16 %v1078_v11, %v1078_v11  ;;  %v999_v24 = vsel %vm144_vm4, %v2065_v13, %v998_v12  ;;  %v1002_v21 = vsel %vm132_vm1, %v2091_v27, %v2088_v26 }
  0x49   :  { %1035 = vrot.lane.b32.xlu0 %v1033_v7, %s1742_s0  ;;  %v709_v1 = vsel %vm147_vm5, %v1906_v43, %v708_v17  ;;  %v1000_v0 = vsel %vm147_vm5, %v2074_v18, %v999_v24  ;;  %v1003_v19 = vsel %vm135_vm3, %v2096_v31, %v1002_v21  ;;  %v1053_v8 = vsel %vm132_vm1, %v2109_v62, %v2106_v61 }
  0x4a   :  { %v710_v15 = vsel %vm150_vm6, %v1945_v57, %v709_v1  ;;  %v1001_v5 = vsel %vm150_vm6, %v2083_v23, %v1000_v0  ;;  %v1004_v7 = vsel %vm138_vm0, %v2099_v32, %v1003_v19  ;;  %v1054_v11 = vsel %vm135_vm3, %v2112_v63, %v1053_v8 }
  0x4b   :  { %719 = vrot.lane.b32.xlu1 %v716_v25, %s1741_s27  ;;  %v715_v24 = vpack.c.b16 %v710_v15, %v703_v14  ;;  %v1005_v12 = vsel %vm141_vm2, %v1908_v44, %v1004_v7  ;;  %v1055_v17 = vsel %vm138_vm0, %v2189_v28, %v1054_v11  ;;  %v1066_v21 = vsel %vm147_vm5, %v2056_v9, %v2045_v4 }
  0x4c   :  { %v1006_v1 = vsel %vm144_vm4, %v2102_v33, %v1005_v12  ;;  %v1057_v0 = vpack.c.b16 %v1055_v17, %v1055_v17  ;;  %v1067_v63 = vsel %vm150_vm6, %v1890_v35, %v1066_v21  ;;  %v1068_v25 = vsel %vm132_vm1, %v2074_v18, %v2065_v13 }
  0x4d   :  { %717 = vrot.lane.b32.xlu0 %v715_v24, %s1741_s27  ;;  %v1007_v28 = vsel %vm147_vm5, %v2106_v61, %v1006_v1  ;;  %v1069_v14 = vsel %vm135_vm3, %v2083_v23, %v1068_v25  ;;  %v1043_v19 = vsel %vm144_vm4, %v2056_v9, %v2045_v4  ;;  %v1046_v8 = vsel %vm132_vm1, %v2083_v23, %v2074_v18 }
  0x4e   :  { %v1008_v15 = vsel %vm150_vm6, %v2109_v62, %v1007_v28  ;;  %v1070_v7 = vsel %vm138_vm0, %v2088_v26, %v1069_v14  ;;  %v1044_v61 = vsel %vm147_vm5, %v1890_v35, %v1043_v19  ;;  %v1047_v11 = vsel %vm135_vm3, %v2088_v26, %v1046_v8 }
  0x4f   :  { %1014 = vrot.lane.b32.xlu1 %v1011_v22, %s1742_s0  ;;  %v1010_v24 = vpack.c.b16 %v1008_v15, %v1001_v5  ;;  %v1071_v4 = vsel %vm141_vm2, %v2091_v27, %v1070_v7  ;;  %v1045_v9 = vsel %vm150_vm6, %v2065_v13, %v1044_v61  ;;  %v1048_v18 = vsel %vm138_vm0, %v2091_v27, %v1047_v11  ;;  %v516_v61 = vld [vmem:[%s3127_s4] sm:$0xff]  ;;  %v517_v11 = vld [vmem:[%s3127_s4 + $0x8] sm:$0xff] }
  0x50   :  { %v1072_v23 = vsel %vm144_vm4, %v2096_v31, %v1071_v4  ;;  %v1049_v62 = vsel %vm141_vm2, %v2096_v31, %v1048_v18  ;;  %v750_v26 = vsel %vm132_vm1, %v1948_v58, %v1945_v57  ;;  %v742_v22 = vsel %vm150_vm6, %v1888_v34, %v1918_v48  ;;  %v95_v57 = vld [vmem:[%s3125_s2] sm:$0xff]  ;;  %v96_v48 = vld [vmem:[%s3125_s2 + $0x8] sm:$0xff] }
  0x51   :  { %1012 = vrot.lane.b32.xlu0 %v1010_v24, %s1742_s0  ;;  %v1073_v13 = vsel %vm147_vm5, %v2099_v32, %v1072_v23  ;;  %v1050_v27 = vsel %vm144_vm4, %v2099_v32, %v1049_v62  ;;  %v751_v5 = vsel %vm135_vm3, %v1951_v59, %v750_v26  ;;  %v743_v31 = vsel %vm132_vm1, %v1927_v51, %v1921_v49 }
  0x52   :  { %v1074_v58 = vsel %vm150_vm6, %v1908_v44, %v1073_v13  ;;  %v1051_v32 = vsel %vm147_vm5, %v1908_v44, %v1050_v27  ;;  %v752_v59 = vsel %vm138_vm0, %v1954_v60, %v751_v5  ;;  %v744_v49 = vsel %vm135_vm3, %v1930_v52, %v743_v31 }
  0x53   :  { %1083 = vrot.lane.b32.xlu1 %v1080_v10, %s1742_s0  ;;  %v1079_v51 = vpack.c.b16 %v1074_v58, %v1067_v63  ;;  %v1052_v12 = vsel %vm150_vm6, %v2102_v33, %v1051_v32  ;;  %v753_v17 = vsel %vm141_vm2, %v2001_v20, %v752_v59  ;;  %v745_v21 = vsel %vm138_vm0, %v1933_v53, %v744_v49 }
  0x54   :  { %v1056_v1 = vpack.c.b16 %v1052_v12, %v1045_v9  ;;  %v754_v25 = vsel %vm144_vm4, %v1886_v30, %v753_v17  ;;  %v746_v60 = vsel %vm141_vm2, %v1936_v54, %v745_v21  ;;  %v97_v52 = vpack.c.bf16 %v96_v48, %v95_v57 }
  0x55   :  { %1081 = vrot.lane.b32.xlu0 %v1079_v51, %s1742_s0  ;;  %v756_v10 = vpack.c.b16 %v754_v25, %v754_v25  ;;  %v747_v33 = vsel %vm144_vm4, %v1939_v55, %v746_v60  ;;  %v133_v20 = vsel %vm132_vm1, %v2198_v3, %v1883_v29  ;;  %v2422_v53 = vrot.slane %v1894_v37, 4 }
  0x56   :  { %v748_v30 = vsel %vm147_vm5, %v1942_v56, %v747_v33  ;;  %1574 = vmatprep.subr.bf16.mxu0 %v97_v52  ;;  %v136_v54 = vsel %vm135_vm3, %v2234_v2, %v133_v20  ;;  %v2429_v63 = vrot.slane %v1898_v39, 3  ;;  %v2432_v28 = vrot.slane %v1900_v40, 2  ;;  %v518_v20 = vld [vmem:[%s3127_s4 + $0x10] sm:$0xff] }
  0x57   :  { %1060 = vrot.lane.b32.xlu1 %v1057_v0, %s1742_s0  ;;  %v749_v55 = vsel %vm150_vm6, %v1906_v43, %v748_v30  ;;  %1575 = vmatpush3.bf16.msra.mxu0 %v97_v52  ;;  %v139_v14 = vsel %vm138_vm0, %v2267_v38, %v136_v54  ;;  %v2440_v56 = vrot.slane %v1902_v41, 1  ;;  %v2443_v19 = vrot.slane %v1906_v43, 7  ;;  %v519_v30 = vld [vmem:[%s3127_s4 + $0x18] sm:$0xff] }
  0x58   :  { %v755_v8 = vpack.c.b16 %v749_v55, %v742_v22  ;;  %v142_v15 = vsel %vm141_vm2, %v2422_v53, %v139_v14  ;;  %v2448_v7 = vrot.slane %v1908_v44, 6  ;;  %v2451_v0 = vrot.slane %v1910_v45, 5 }
  0x59   :  { %1058 = vrot.lane.b32.xlu0 %v1056_v1, %s1742_s0  ;;  %v145_v24 = vsel %vm144_vm4, %v2429_v63, %v142_v15  ;;  %v153_v4 = vsel %vm132_vm1, %v2443_v19, %v1904_v42  ;;  %v2466_v9 = vrot.slane %v1913_v46, 4  ;;  %v2469_v18 = vrot.slane %v1915_v47, 3 }
  0x5a   :  { %v148_v23 = vsel %vm147_vm5, %v2432_v28, %v145_v24  ;;  %v155_v62 = vsel %vm135_vm3, %v2448_v7, %v153_v4  ;;  %v2476_v26 = vrot.slane %v1974_v6, 2  ;;  %vm370_vm7 = vcmask 130048  }
  0x5b   :  { %759 = vrot.lane.b32.xlu1 %v756_v10, %s1741_s27  ;;  %v157_v22 = vsel %vm138_vm0, %v2451_v0, %v155_v62  ;;  %v2482_v13 = vrot.slane %v1863_v16, 1  ;;  %v520_v27 = vpack.c.bf16 %v517_v11, %v516_v61  ;;  %v225_v5 = vrot.slane %v1883_v29, 3 }
  0x5c   :  { %v151_v31 = vsel %vm150_vm6, %v2440_v56, %v148_v23  ;;  %v159_v57 = vsel %vm141_vm2, %v2466_v9, %v157_v22  ;;  %v226_v48 = vrot.slane %v1888_v34, 2  ;;  %v228_v58 = vrot.slane %v1890_v35, 1 }
  0x5d   :  { %757 = vrot.lane.b32.xlu0 %v755_v8, %s1741_s27  ;;  %v161_v32 = vsel %vm144_vm4, %v2469_v18, %v159_v57  ;;  %1593 = vmatpush3.bf16.msra.mxu1 %v520_v27  ;;  %v231_v59 = vrot.slane %v1894_v37, 7  ;;  %v233_v49 = vrot.slane %v1898_v39, 6  ;;  %v235_v51 = vrot.slane %v1900_v40, 5 }
  0x5e   :  { %v163_v12 = vsel %vm147_vm5, %v2476_v26, %v161_v32  ;;  %v227_v17 = vsel %vm132_vm1, %v226_v48, %v225_v5  ;;  %v237_v21 = vrot.slane %v1902_v41, 4  ;;  %v239_v1 = vrot.slane %v1904_v42, 3  ;;  %v3143_v48 = vld [vmem:[#allocation8_spill] sm:$0xff] }
  0x5f   :  { %v3142_v25 = vmov 0.0   ;;  %v165_v60 = vsel %vm150_vm6, %v2482_v13, %v163_v12  ;;  %v229_v52 = vsel %vm135_vm3, %v228_v58, %v227_v17  ;;  %v240_v10 = vrot.slane %v1906_v43, 2 }
  0x60   :  { %1594 = vmatprep.subr.bf16.mxu1 %v3142_v25  ;;  %v242_v33 = vrot.slane %v1908_v44, 1  ;;  %v2514_v54 = vpack.c.b16 %v165_v60, %v151_v31  ;;  %v230_v55 = vsel %vm138_vm0, %v1892_v36, %v229_v52  ;;  %v245_v14 = vrot.slane %v1913_v46, 7 }
  0x61   :  { %v247_v8 = vrot.slane %v1915_v47, 6  ;;  %v232_v15 = vsel %vm141_vm2, %v231_v59, %v230_v55  ;;  %v241_v61 = vsel %vm132_vm1, %v240_v10, %v239_v1  ;;  %v249_v11 = vrot.slane %v1974_v6, 5 }
  0x62   :  { %v251_v24 = vrot.slane %v1863_v16, 4  ;;  %1576 = vmatprep.mubr.msk.bf16.mxu0 %vm370_vm7, %v2514_v54  ;;  %v234_v4 = vsel %vm144_vm4, %v233_v49, %v232_v15  ;;  %v243_v23 = vsel %vm135_vm3, %v242_v33, %v241_v61  ;;  %v521_v62 = vpack.c.bf16 %v519_v30, %v518_v20 }
  0x63   :  { %v567_v22 = vsel %vm138_vm0, %v2198_v3, %v1883_v29  ;;  %1577 = vmatmul.mubr.msk.bf16.vlgmr.msra.gmra.mrb[0].mxu0 %vm370_vm7, %v2027_v50  ;;  %v236_v27 = vsel %vm147_vm5, %v235_v51, %v234_v4  ;;  %v244_v5 = vsel %vm138_vm0, %v1910_v45, %v243_v23  ;;  %v572_v57 = vsel %vm132_vm1, %v2440_v56, %v2432_v28 }
  0x64   :  { %v568_v31 = vsel %vm141_vm2, %v2234_v2, %v567_v22  ;;  %1580 = vmatprep.mubr.msk.bf16.mxu0 %vm370_vm7, %v3143_v48  ;;  %v238_v58 = vsel %vm150_vm6, %v237_v21, %v236_v27  ;;  %v246_v32 = vsel %vm141_vm2, %v245_v14, %v244_v5  ;;  %1595 = vmatpush3.bf16.msra.mxu1 %v521_v62  ;;  %vm1743_vm8 = vmmov 0  }
  0x65   :  { %v569_v50 = vsel %vm144_vm4, %v2267_v38, %v568_v31  ;;  %v248_v59 = vsel %vm144_vm4, %v247_v8, %v246_v32  ;;  %v573_v51 = vsel %vm135_vm3, %v1904_v42, %v572_v57  ;;  %1596 = vmatprep.mubr.msk.bf16.mxu1 %vm1743_vm8, %v3142_v25  ;;  %1650 = vmatprep.subr.bf16.mxu1 %v3142_v25  ;;  %v254_v32 = vrot.slane %v1883_v29, 4 }
  0x66   :  { %v570_v49 = vsel %vm147_vm5, %v2422_v53, %v569_v50  ;;  %v250_v12 = vsel %vm147_vm5, %v249_v11, %v248_v59  ;;  %v574_v21 = vsel %vm138_vm0, %v2443_v19, %v573_v51  ;;  %v607_v1 = vsel %vm141_vm2, %v2198_v3, %v1883_v29 }
  0x67   :  { %v2558_v17 = vsel %vm150_vm6, %v2429_v63, %v570_v49  ;;  %v252_v60 = vsel %vm150_vm6, %v251_v24, %v250_v12  ;;  %v575_v52 = vsel %vm141_vm2, %v2448_v7, %v574_v21  ;;  %v608_v10 = vsel %vm144_vm4, %v2234_v2, %v607_v1 }
  0x68   :  { %v611_v33 = vsel %vm132_vm1, %v2432_v28, %v2429_v63  ;;  %v253_v20 = vpack.c.b16 %v252_v60, %v238_v58  ;;  %v576_v30 = vsel %vm144_vm4, %v2451_v0, %v575_v52  ;;  %v609_v55 = vsel %vm147_vm5, %v2267_v38, %v608_v10 }
  0x69   :  { %v612_v14 = vsel %vm135_vm3, %v2440_v56, %v611_v33  ;;  %v577_v8 = vsel %vm147_vm5, %v2466_v9, %v576_v30  ;;  %v2583_v15 = vsel %vm150_vm6, %v2422_v53, %v609_v55  ;;  %v527_v11 = vsel %vm135_vm3, %v2198_v3, %v1883_v29 }
  0x6a   :  { %v613_v61 = vsel %vm138_vm0, %v1904_v42, %v612_v14  ;;  %v2592_v24 = vsel %vm150_vm6, %v2469_v18, %v577_v8  ;;  %v528_v23 = vsel %vm138_vm0, %v2234_v2, %v527_v11  ;;  %v533_v62 = vsel %vm132_vm1, %v1904_v42, %v2440_v56 }
  0x6b   :  { %v614_v4 = vsel %vm141_vm2, %v2443_v19, %v613_v61  ;;  %1581 = vmatmul.mubr.msk.bf16.gmra.mrb[4].mxu0 %vm370_vm7, %v253_v20  ;;  %v580_v22 = vpack.c.b16 %v2592_v24, %v2558_v17  ;;  %v529_v5 = vsel %vm141_vm2, %v2267_v38, %v528_v23  ;;  %v534_v31 = vsel %vm135_vm3, %v2443_v19, %v533_v62 }
  0x6c   :  { %v615_v27 = vsel %vm144_vm4, %v2448_v7, %v614_v4  ;;  %v530_v48 = vsel %vm144_vm4, %v2422_v53, %v529_v5  ;;  %v535_v58 = vsel %vm138_vm0, %v2448_v7, %v534_v31  ;;  %v255_v51 = vrot.slane %v1888_v34, 3 }
  0x6d   :  { %v616_v57 = vsel %vm147_vm5, %v2451_v0, %v615_v27  ;;  %v531_v59 = vsel %vm147_vm5, %v2429_v63, %v530_v48  ;;  %v536_v49 = vsel %vm141_vm2, %v2451_v0, %v535_v58  ;;  %v257_v60 = vrot.slane %v1890_v35, 2 }
  0x6e   :  { %v2619_v50 = vsel %vm150_vm6, %v2466_v9, %v616_v57  ;;  %v2630_v21 = vsel %vm150_vm6, %v2432_v28, %v531_v59  ;;  %v537_v1 = vsel %vm144_vm4, %v2466_v9, %v536_v49  ;;  %v256_v10 = vsel %vm132_vm1, %v255_v51, %v254_v32 }
  0x6f   :  { %v620_v12 = vpack.c.b16 %v2619_v50, %v2583_v15  ;;  %v538_v52 = vsel %vm147_vm5, %v2469_v18, %v537_v1  ;;  %v259_v33 = vrot.slane %v1892_v36, 1  ;;  %v262_v20 = vrot.slane %v1898_v39, 7 }
  0x70   :  { %v2642_v30 = vsel %vm150_vm6, %v2476_v26, %v538_v52  ;;  %v258_v55 = vsel %vm135_vm3, %v257_v60, %v256_v10  ;;  %v264_v14 = vrot.slane %v1900_v40, 6  ;;  %v268_v11 = vrot.slane %v1904_v42, 4 }
  0x71   :  { %v540_v8 = vpack.c.b16 %v2642_v30, %v2630_v21  ;;  %v260_v61 = vsel %vm138_vm0, %v259_v33, %v258_v55  ;;  %v269_v4 = vrot.slane %v1906_v43, 3  ;;  %v266_v62 = vrot.slane %v1902_v41, 5 }
  0x72   :  { %v261_v23 = vsel %vm141_vm2, %v1894_v37, %v260_v61  ;;  %v271_v27 = vrot.slane %v1908_v44, 2  ;;  %v273_v5 = vrot.slane %v1910_v45, 1  ;;  %v276_v48 = vrot.slane %v1915_v47, 7 }
  0x73   :  { %v263_v31 = vsel %vm144_vm4, %v262_v20, %v261_v23  ;;  %v270_v57 = vsel %vm132_vm1, %v269_v4, %v268_v11  ;;  %v278_v58 = vrot.slane %v1974_v6, 6  ;;  %v283_v49 = vrot.slane %v1883_v29, 5 }
  0x74   :  { %v265_v32 = vsel %vm147_vm5, %v264_v14, %v263_v31  ;;  %v272_v59 = vsel %vm135_vm3, %v271_v27, %v270_v57  ;;  %v284_v51 = vrot.slane %v1888_v34, 4  ;;  %v280_v60 = vrot.slane %v1863_v16, 5  ;;  %v960_v57 = vld [vmem:[%s3129_s6] sm:$0xff] }
  0x75   :  { %v274_v1 = vsel %vm138_vm0, %v273_v5, %v272_v59  ;;  %v286_v52 = vrot.slane %v1890_v35, 3  ;;  %v288_v10 = vrot.slane %v1892_v36, 2  ;;  %v267_v33 = vsel %vm150_vm6, %v266_v62, %v265_v32 }
  0x76   :  { %v275_v20 = vsel %vm141_vm2, %v1913_v46, %v274_v1  ;;  %v285_v55 = vsel %vm132_vm1, %v284_v51, %v283_v49  ;;  %v290_v14 = vrot.slane %v1894_v37, 1  ;;  %v293_v4 = vrot.slane %v1900_v40, 7 }
  0x77   :  { %v277_v61 = vsel %vm144_vm4, %v276_v48, %v275_v20  ;;  %v287_v11 = vsel %vm135_vm3, %v286_v52, %v285_v55  ;;  %v297_v23 = vrot.slane %v1904_v42, 5  ;;  %v298_v62 = vrot.slane %v1906_v43, 4  ;;  %v961_v48 = vld [vmem:[%s3129_s6 + $0x8] sm:$0xff] }
  0x78   :  { %v279_v27 = vsel %vm147_vm5, %v278_v58, %v277_v61  ;;  %v289_v5 = vsel %vm138_vm0, %v288_v10, %v287_v11  ;;  %v300_v31 = vrot.slane %v1908_v44, 3  ;;  %v302_v58 = vrot.slane %v1910_v45, 2 }
  0x79   :  { %v281_v32 = vsel %vm150_vm6, %v280_v60, %v279_v27  ;;  %v291_v59 = vsel %vm141_vm2, %v290_v14, %v289_v5  ;;  %v304_v49 = vrot.slane %v1913_v46, 1  ;;  %v295_v52 = vrot.slane %v1902_v41, 6 }
  0x7a   :  { %v282_v51 = vpack.c.b16 %v281_v32, %v267_v33  ;;  %v292_v1 = vsel %vm144_vm4, %v1898_v39, %v291_v59  ;;  %v299_v10 = vsel %vm132_vm1, %v298_v62, %v297_v23  ;;  %v307_v60 = vrot.slane %v1974_v6, 7 }
  0x7b   :  { %v294_v20 = vsel %vm147_vm5, %v293_v4, %v292_v1  ;;  %v301_v55 = vsel %vm135_vm3, %v300_v31, %v299_v10  ;;  %v966_v61 = vpack.c.bf16 %v961_v48, %v960_v57  ;;  %v309_v33 = vrot.slane %v1863_v16, 6 }
  0x7c   :  { %1584 = vmatprep.mubr.msk.bf16.mxu0 %vm370_vm7, %v282_v51  ;;  %v303_v14 = vsel %vm138_vm0, %v302_v58, %v301_v55  ;;  %v2704_v11 = vsel %vm132_vm1, %v2482_v13, %v2476_v26  ;;  %v647_v4 = vsel %vm144_vm4, %v2198_v3, %v1883_v29  ;;  %v650_v5 = vsel %vm132_vm1, %v2429_v63, %v2422_v53 }
  0x7d   :  { %v305_v23 = vsel %vm141_vm2, %v304_v49, %v303_v14  ;;  %1624 = vmatprep.subr.bf16.mxu0 %v966_v61  ;;  %v648_v27 = vsel %vm147_vm5, %v2234_v2, %v647_v4  ;;  %v296_v62 = vsel %vm150_vm6, %v295_v52, %v294_v20  ;;  %v651_v57 = vsel %vm135_vm3, %v2432_v28, %v650_v5 }
  0x7e   :  { %v306_v31 = vsel %vm144_vm4, %v1915_v47, %v305_v23  ;;  %1625 = vmatpush3.bf16.msra.mxu0 %v966_v61  ;;  %v618_v48 = vsel %vm132_vm1, %v2476_v26, %v2469_v18  ;;  %v652_v59 = vsel %vm138_vm0, %v2440_v56, %v651_v57  ;;  %v312_v49 = vrot.slane %v1883_v29, 6 }
  0x7f   :  { %v308_v32 = vsel %vm147_vm5, %v307_v60, %v306_v31  ;;  %v2728_v58 = vsel %vm135_vm3, %v2482_v13, %v618_v48  ;;  %v2734_v1 = vsel %vm150_vm6, %v2267_v38, %v648_v27  ;;  %v653_v52 = vsel %vm141_vm2, %v1904_v42, %v652_v59 }
  0x80   :  { %v310_v51 = vsel %vm150_vm6, %v309_v33, %v308_v32  ;;  %v313_v10 = vrot.slane %v1888_v34, 5  ;;  %v654_v55 = vsel %vm144_vm4, %v2443_v19, %v653_v52  ;;  %v315_v60 = vrot.slane %v1890_v35, 4 }
  0x81   :  { %v311_v20 = vpack.c.b16 %v310_v51, %v296_v62  ;;  %v317_v61 = vrot.slane %v1892_v36, 3  ;;  %v655_v14 = vsel %vm147_vm5, %v2448_v7, %v654_v55  ;;  %v319_v4 = vrot.slane %v1894_v37, 2 }
  0x82   :  { %v314_v33 = vsel %vm132_vm1, %v313_v10, %v312_v49  ;;  %v321_v23 = vrot.slane %v1898_v39, 1  ;;  %v2751_v27 = vsel %vm150_vm6, %v2451_v0, %v655_v14  ;;  %v324_v62 = vrot.slane %v1902_v41, 7 }
  0x83   :  { %1585 = vmatmul.mubr.msk.bf16.gmra.mrb[8].mxu0 %vm370_vm7, %v311_v20  ;;  %v316_v5 = vsel %vm135_vm3, %v315_v60, %v314_v33  ;;  %v326_v31 = vrot.slane %v1904_v42, 6  ;;  %v327_v32 = vrot.slane %v1906_v43, 5  ;;  %v329_v59 = vrot.slane %v1908_v44, 4 }
  0x84   :  { %v318_v48 = vsel %vm138_vm0, %v317_v61, %v316_v5  ;;  %v331_v51 = vrot.slane %v1910_v45, 3  ;;  %v333_v52 = vrot.slane %v1913_v46, 2  ;;  %v335_v10 = vrot.slane %v1915_v47, 1 }
  0x85   :  { %v320_v49 = vsel %vm141_vm2, %v319_v4, %v318_v48  ;;  %v328_v55 = vsel %vm132_vm1, %v327_v32, %v326_v31  ;;  %v338_v60 = vrot.slane %v1863_v16, 7  ;;  %v341_v61 = vrot.slane %v1883_v29, 7 }
  0x86   :  { %v322_v20 = vsel %vm144_vm4, %v321_v23, %v320_v49  ;;  %v330_v33 = vsel %vm135_vm3, %v329_v59, %v328_v55  ;;  %v342_v4 = vrot.slane %v1888_v34, 6  ;;  %v344_v5 = vrot.slane %v1890_v35, 5 }
  0x87   :  { %v323_v14 = vsel %vm147_vm5, %v1900_v40, %v322_v20  ;;  %v332_v57 = vsel %vm138_vm0, %v331_v51, %v330_v33  ;;  %v346_v23 = vrot.slane %v1892_v36, 4  ;;  %v348_v31 = vrot.slane %v1894_v37, 3  ;;  %v964_v33 = vld [vmem:[%s3129_s6 + $0x20] sm:$0xff] }
  0x88   :  { %v325_v48 = vsel %vm150_vm6, %v324_v62, %v323_v14  ;;  %v334_v32 = vsel %vm141_vm2, %v333_v52, %v332_v57  ;;  %v343_v49 = vsel %vm132_vm1, %v342_v4, %v341_v61  ;;  %v350_v20 = vrot.slane %v1898_v39, 2  ;;  %v963_v61 = vld [vmem:[%s3129_s6 + $0x18] sm:$0xff] }
  0x89   :  { %v352_v59 = vrot.slane %v1900_v40, 1  ;;  %v336_v34 = vsel %vm144_vm4, %v335_v10, %v334_v32  ;;  %v345_v35 = vsel %vm135_vm3, %v344_v5, %v343_v49  ;;  %v355_v62 = vrot.slane %v1904_v42, 7 }
  0x8a   :  { %v356_v51 = vrot.slane %v1906_v43, 6  ;;  %v337_v36 = vsel %vm147_vm5, %v1974_v6, %v336_v34  ;;  %v347_v37 = vsel %vm138_vm0, %v346_v23, %v345_v35  ;;  %v358_v57 = vrot.slane %v1908_v44, 5  ;;  %v962_v43 = vld [vmem:[%s3129_s6 + $0x10] sm:$0xff] }
  0x8b   :  { %v360_v52 = vrot.slane %v1910_v45, 4  ;;  %v339_v39 = vsel %vm150_vm6, %v338_v60, %v337_v36  ;;  %v349_v40 = vsel %vm141_vm2, %v348_v31, %v347_v37  ;;  %v362_v55 = vrot.slane %v1913_v46, 3  ;;  %v965_v46 = vld [vmem:[%s3129_s6 + $0x28] sm:$0xff] }
  0x8c   :  { %v357_v10 = vsel %vm132_vm1, %v356_v51, %v355_v62  ;;  %v340_v14 = vpack.c.b16 %v339_v39, %v325_v48  ;;  %v351_v44 = vsel %vm144_vm4, %v350_v20, %v349_v40  ;;  %v364_v60 = vrot.slane %v1915_v47, 2 }
  0x8d   :  { %v359_v45 = vsel %vm135_vm3, %v358_v57, %v357_v10  ;;  %v353_v4 = vsel %vm147_vm5, %v352_v59, %v351_v44  ;;  %v366_v48 = vrot.slane %v1974_v6, 1  ;;  %v967_v31 = vpack.c.bf16 %v963_v61, %v962_v43 }
  0x8e   :  { %v361_v5 = vsel %vm138_vm0, %v360_v52, %v359_v45  ;;  %1588 = vmatprep.mubr.msk.bf16.mxu0 %vm370_vm7, %v340_v14  ;;  %v354_v47 = vsel %vm150_vm6, %v1902_v41, %v353_v4  ;;  %v968_v49 = vpack.c.bf16 %v965_v46, %v964_v33  ;;  %v657_v20 = vsel %vm132_vm1, %v2469_v18, %v2466_v9 }
  0x8f   :  { %v363_v23 = vsel %vm141_vm2, %v362_v55, %v361_v5  ;;  %1626 = vmatprep.subr.bf16.mxu0 %v967_v31  ;;  %v658_v6 = vsel %vm135_vm3, %v2476_v26, %v657_v20  ;;  %v696_v35 = vsel %vm132_vm1, %v2466_v9, %v2451_v0  ;;  %v735_v39 = vsel %vm132_vm1, %v2451_v0, %v2448_v7  ;;  %v560_v14 = vpop.permute.xlu1 %559 }
  0x90   :  { %v365_v32 = vsel %vm144_vm4, %v364_v60, %v363_v23  ;;  %1627 = vmatpush3.bf16.msra.mxu0 %v967_v31  ;;  %v2828_v41 = vsel %vm138_vm0, %v2482_v13, %v658_v6  ;;  %v697_v51 = vsel %vm135_vm3, %v2469_v18, %v696_v35  ;;  %v736_v10 = vsel %vm135_vm3, %v2466_v9, %v735_v39 }
  0x91   :  { %v367_v59 = vsel %vm147_vm5, %v366_v48, %v365_v32  ;;  %1628 = vmatprep.subr.bf16.mxu0 %v968_v49  ;;  %v698_v36 = vsel %vm138_vm0, %v2476_v26, %v697_v51  ;;  %v728_v55 = vsel %vm132_vm1, %v2267_v38, %v2234_v2  ;;  %v737_v61 = vsel %vm138_vm0, %v2469_v18, %v736_v10 }
  0x92   :  { %v368_v34 = vsel %vm150_vm6, %v1863_v16, %v367_v59  ;;  %v689_v16 = vsel %vm132_vm1, %v2422_v53, %v2267_v38  ;;  %v2843_v37 = vsel %vm141_vm2, %v2482_v13, %v698_v36  ;;  %v729_v0 = vsel %vm135_vm3, %v2422_v53, %v728_v55 }
  0x93   :  { %v369_v62 = vpack.c.b16 %v368_v34, %v354_v47  ;;  %v690_v57 = vsel %vm135_vm3, %v2429_v63, %v689_v16  ;;  %v738_v9 = vsel %vm141_vm2, %v2476_v26, %v737_v61  ;;  %v730_v38 = vsel %vm138_vm0, %v2429_v63, %v729_v0 }
  0x94   :  { %1629 = vmatpush3.bf16.msra.mxu0 %v968_v49  ;;  %v691_v52 = vsel %vm138_vm0, %v2432_v28, %v690_v57  ;;  %v2878_v18 = vsel %vm144_vm4, %v2482_v13, %v738_v9  ;;  %v731_v53 = vsel %vm141_vm2, %v2432_v28, %v730_v38  ;;  %vm828_vm9 = vcmask 261120  }
  0x95   :  { %1589 = vmatmul.mubr.msk.bf16.gmra.mrb[12].mxu0 %vm370_vm7, %v369_v62  ;;  %v692_v40 = vsel %vm141_vm2, %v2440_v56, %v691_v52  ;;  %1642 = vmatprep.subr.bf16.mxu0 %v3142_v25  ;;  %v2884_v60 = vsel %vm144_vm4, %v2440_v56, %v731_v53  ;;  %v581_v5 = vpack.c.b16 %v2704_v11, %v2704_v11  ;;  %vm767_vm10 = vsmask.f32 7424 }
  0x96   :  { %v693_v43 = vsel %vm144_vm4, %v1904_v42, %v692_v40  ;;  %v621_v21 = vpack.c.b16 %v2728_v58, %v2728_v58  ;;  %vm780_vm11 = vcmask 1046528   ;;  %v3144_v10 = vpack.c.b16 %v2751_v27, %v2734_v1 }
  0x97   :  { %v694_v44 = vsel %vm147_vm5, %v2443_v19, %v693_v43  ;;  %v661_v61 = vpack.c.b16 %v2828_v41, %v2828_v41  ;;  %vm784_vm12 = vsmask.f32 6400  ;;  %vm1139_vm13 = vcmask 392192  }
  0x98   :  { %v2874_v45 = vsel %vm150_vm6, %v2448_v7, %v694_v44  ;;  %v541_v7 = vpack.c.b16 %v2482_v13, %v2482_v13  ;;  %v687_v41 = vsel %vm147_vm5, %v2198_v3, %v1883_v29  ;;  %vm802_vm14 = vcmask 1045504  }
  0x99   :  { %vm806_vm15 = vsmask.f32 5376  ;;  %vm824_vm0 = vcmask 1044480   ;;  %vm1274_vm1 = vcmask 64512  }
  0x9a   :  { %v566_v28 = vsel %vm370_vm7, %v541_v7, %v560_v14 }
  0x9b   :  { %v774_v17 = vshll.u32 %v566_v28, 16 }
  0x9c   :  { %v598_v33 = vpop.permute.xlu1 %597 }
  0x9d   :  { %v524_v26 = vpop.permute.xlu0 %523  ;;  %v2898_v56 = vsel %vm370_vm7, %v580_v22, %v598_v33  ;;  %v776_v30 = vrot.slane %v774_v17, 1  ;;  %v701_v17 = vpack.c.b16 %v2843_v37, %v2843_v37 }
  0x9e   :  { %v526_v63 = vsel %vm370_vm7, %v2514_v54, %v524_v26  ;;  %v781_v22 = vrot.slane %v2898_v56, 1 }
  0x9f   :  { %1597 = vmatmul.mubr.msk.bf16.vlgmr.msra.gmra.mrb[0].mxu1 %vm828_vm9, %v526_v63 }
  0xa0   :  { %1600 = vmatprep.mubr.msk.bf16.mxu1 %vm1743_vm8, %v3142_v25 }
  0xa3   :  { %v638_v46 = vpop.permute.xlu1 %637 }
  0xa4   :  { %v2904_v54 = vsel %vm370_vm7, %v620_v12, %v638_v46 }
  0xa5   :  { %v558_v4 = vpop.permute.xlu0 %557  ;;  %v785_v48 = vshrl.u32 %v2904_v54, 16  ;;  %v788_v23 = vshll.u32 %v2904_v54, 16 }
  0xa6   :  { %v563_v13 = vsel %vm370_vm7, %v540_v8, %v558_v4  ;;  %v688_v4 = vsel %vm150_vm6, %v2234_v2, %v687_v41 }
  0xa7   :  { %v770_v24 = vshll.u32 %v563_v13, 16  ;;  %v768_v15 = vshrl.u32 %v563_v13, 16  ;;  %v787_v47 = vrot.slane %v785_v48, 1  ;;  %v790_v32 = vrot.slane %v788_v23, 2 }
  0xa9   :  { %v772_v50 = vrot.slane %v770_v24, 1  ;;  %v600_v12 = vpop.permute.xlu0 %599  ;;  %v791_v36 = vor.u32 %v790_v32, %v787_v47 }
  0xaa   :  { %v2916_v31 = vsel %vm370_vm7, %v581_v5, %v600_v12 }
  0xab   :  { %v773_v8 = vor.u32 %v772_v50, %v768_v15  ;;  %v782_v11 = vrot.slane %v2916_v31, 1  ;;  %v700_v15 = vpack.c.b16 %v2874_v45, %v688_v4 }
  0xad   :  { %v990_v49 = vpop.permute.xlu1 %989  ;;  %v640_v20 = vpop.permute.xlu0 %639  ;;  %v777_v59 = vsel %vm767_vm10, %v773_v8, %v776_v30  ;;  %v783_v6 = vsel %vm780_vm11, %v781_v22, %v782_v11 }
  0xae   :  { %v994_v34 = vsel %vm828_vm9, %v563_v13, %v990_v49  ;;  %v646_v35 = vsel %vm370_vm7, %v621_v21, %v640_v20  ;;  %1601 = vmatmul.mubr.msk.bf16.gmra.mrb[4].mxu1 %vm828_vm9, %v777_v59 }
  0xaf   :  { %v1091_v58 = vshll.u32 %v994_v34, 16  ;;  %v792_v62 = vshrl.u32 %v646_v35, 16  ;;  %v795_v51 = vshll.u32 %v646_v35, 16  ;;  %1604 = vmatprep.mubr.msk.bf16.mxu1 %vm1743_vm8, %v3142_v25  ;;  %v1089_v0 = vshrl.u32 %v994_v34, 16 }
  0xb1   :  { %v1093_v16 = vrot.slane %v1091_v58, 1  ;;  %v678_v57 = vpop.permute.xlu1 %677  ;;  %v794_v52 = vrot.slane %v792_v62, 1  ;;  %v797_v39 = vrot.slane %v795_v51, 2  ;;  %v992_v40 = vpop.permute.xlu0 %991 }
  0xb2   :  { %v2932_v55 = vsel %vm370_vm7, %v3144_v10, %v678_v57  ;;  %v996_v43 = vsel %vm828_vm9, %v566_v28, %v992_v40 }
  0xb3   :  { %v798_v14 = vor.u32 %v797_v39, %v794_v52  ;;  %v1095_v44 = vshll.u32 %v996_v43, 16  ;;  %v1094_v9 = vor.u32 %v1093_v16, %v1089_v0  ;;  %v803_v38 = vrot.slane %v2932_v55, 2 }
  0xb4   :  { %v733_v0 = vsel %vm147_vm5, %v1904_v42, %v2884_v60  ;;  %v727_v42 = vsel %vm150_vm6, %v2198_v3, %v1883_v29 }
  0xb5   :  { %v971_v53 = vpop.permute.xlu1 %970  ;;  %v1097_v26 = vrot.slane %v1095_v44, 1  ;;  %v680_v33 = vpop.permute.xlu0 %679  ;;  %v799_v1 = vsel %vm784_vm12, %v791_v36, %v798_v14  ;;  %v734_v60 = vsel %vm150_vm6, %v2443_v19, %v733_v0 }
  0xb6   :  { %v973_v27 = vsel %vm828_vm9, %v526_v63, %v971_v53  ;;  %v2941_v7 = vsel %vm370_vm7, %v661_v61, %v680_v33  ;;  %1605 = vmatmul.mubr.msk.bf16.gmra.mrb[8].mxu1 %vm828_vm9, %v783_v6  ;;  %v740_v3 = vpack.c.b16 %v734_v60, %v727_v42 }
  0xb7   :  { %v1098_v28 = vsel %vm767_vm10, %v1094_v9, %v1097_v26  ;;  %1630 = vmatprep.mubr.msk.bf16.mxu0 %vm1139_vm13, %v973_v27  ;;  %v804_v46 = vrot.slane %v2941_v7, 2  ;;  %1608 = vmatprep.mubr.msk.bf16.mxu1 %vm1743_vm8, %v3142_v25 }
  0xb8   :  { %1631 = vmatmul.mubr.msk.bf16.vlgmr.msra.gmra.mrb[16].mxu0 %vm1139_vm13, %v1098_v28 }
  0xb9   :  { %v1038_v63 = vpop.permute.xlu1 %1037  ;;  %v805_v13 = vsel %vm802_vm14, %v803_v38, %v804_v46  ;;  %v741_v46 = vpack.c.b16 %v2878_v18, %v2878_v18 }
  0xba   :  { %v1042_v5 = vsel %vm828_vm9, %v646_v35, %v1038_v63 }
  0xbb   :  { %v1111_v24 = vshrl.u32 %v1042_v5, 16  ;;  %v1114_v22 = vshll.u32 %v1042_v5, 16  ;;  %v1036_v48 = vpop.permute.xlu0 %1035 }
  0xbc   :  { %v1040_v23 = vsel %vm828_vm9, %v2904_v54, %v1036_v48 }
  0xbd   :  { %v720_v50 = vpop.permute.xlu1 %719  ;;  %v1104_v12 = vshrl.u32 %v1040_v23, 16  ;;  %v1107_v21 = vshll.u32 %v1040_v23, 16  ;;  %v1113_v30 = vrot.slane %v1111_v24, 1  ;;  %v1116_v2 = vrot.slane %v1114_v22, 2 }
  0xbe   :  { %v726_v8 = vsel %vm370_vm7, %v701_v17, %v720_v50  ;;  %1609 = vmatmul.mubr.msk.bf16.gmra.mrb[12].mxu1 %vm828_vm9, %v799_v1 }
  0xbf   :  { %v814_v11 = vshrl.u32 %v726_v8, 16  ;;  %v817_v47 = vshll.u32 %v726_v8, 16  ;;  %v1106_v37 = vrot.slane %v1104_v12, 1  ;;  %v718_v32 = vpop.permute.xlu0 %717  ;;  %1612 = vmatprep.mubr.msk.bf16.mxu1 %vm1743_vm8, %v3142_v25  ;;  %v1109_v49 = vrot.slane %v1107_v21, 2 }
  0xc0   :  { %v723_v54 = vsel %vm370_vm7, %v700_v15, %v718_v32  ;;  %v1117_v35 = vor.u32 %v1116_v2, %v1113_v30  ;;  %v1286_v30 = vld [vmem:[%s3133_s10] sm:$0xff]  ;;  %v1287_v2 = vld [vmem:[%s3133_s10 + $0x8] sm:$0xff] }
  0xc1   :  { %v816_v45 = vrot.slane %v814_v11, 2  ;;  %v819_v20 = vrot.slane %v817_v47, 3  ;;  %v1015_v59 = vpop.permute.xlu1 %1014  ;;  %v807_v6 = vshrl.u32 %v723_v54, 16  ;;  %v810_v34 = vshll.u32 %v723_v54, 16 }
  0xc2   :  { %v1110_v58 = vor.u32 %v1109_v49, %v1106_v37  ;;  %v1019_v62 = vsel %vm828_vm9, %v2916_v31, %v1015_v59  ;;  %v1290_v47 = vpack.c.bf16 %v1287_v2, %v1286_v30  ;;  %v1289_v37 = vld [vmem:[%s3133_s10 + $0x18] sm:$0xff] }
  0xc3   :  { %v820_v51 = vor.u32 %v819_v20, %v816_v45  ;;  %v809_v36 = vrot.slane %v807_v6, 2  ;;  %v812_v16 = vrot.slane %v810_v34, 3  ;;  %v1013_v57 = vpop.permute.xlu0 %1012  ;;  %v1102_v40 = vrot.slane %v1019_v62, 1 }
  0xc4   :  { %v1017_v52 = vsel %vm828_vm9, %v2898_v56, %v1013_v57  ;;  %v1118_v39 = vsel %vm784_vm12, %v1110_v58, %v1117_v35  ;;  %1651 = vmatpush3.bf16.msra.mxu1 %v1290_v47 }
  0xc5   :  { %v813_v10 = vor.u32 %v812_v16, %v809_v36  ;;  %v1084_v43 = vpop.permute.xlu1 %1083  ;;  %v1101_v61 = vrot.slane %v1017_v52, 1  ;;  %1652 = vmatprep.subr.bf16.mxu1 %v3142_v25 }
  0xc6   :  { %v1088_v31 = vsel %vm828_vm9, %v726_v8, %v1084_v43  ;;  %1613 = vmatmul.mubr.msk.bf16.gmra.mrb[16].mxu1 %vm828_vm9, %v805_v13  ;;  %v1288_v8 = vld [vmem:[%s3133_s10 + $0x10] sm:$0xff] }
  0xc7   :  { %v1131_v14 = vshrl.u32 %v1088_v31, 16  ;;  %v1134_v44 = vshll.u32 %v1088_v31, 16  ;;  %v1082_v9 = vpop.permute.xlu0 %1081  ;;  %v1103_v56 = vsel %vm780_vm11, %v1101_v61, %v1102_v40  ;;  %1616 = vmatprep.mubr.msk.bf16.mxu1 %vm1743_vm8, %v3142_v25  ;;  %v821_v38 = vsel %vm806_vm15, %v813_v10, %v820_v51 }
  0xc8   :  { %v1086_v53 = vsel %vm828_vm9, %v723_v54, %v1082_v9  ;;  %1634 = vmatprep.mubr.msk.bf16.mxu0 %vm1139_vm13, %v1103_v56  ;;  %v1291_v45 = vpack.c.bf16 %v1289_v37, %v1288_v8 }
  0xc9   :  { %v1133_v26 = vrot.slane %v1131_v14, 2  ;;  %v1136_v33 = vrot.slane %v1134_v44, 3  ;;  %v1061_v1 = vpop.permute.xlu1 %1060  ;;  %v1124_v27 = vshrl.u32 %v1086_v53, 16  ;;  %v1127_v41 = vshll.u32 %v1086_v53, 16  ;;  %1635 = vmatmul.mubr.msk.bf16.gmra.mrb[20].mxu0 %vm1139_vm13, %v1118_v39 }
  0xca   :  { %v1065_v28 = vsel %vm828_vm9, %v2941_v7, %v1061_v1  ;;  %1653 = vmatpush3.bf16.msra.mxu1 %v1291_v45 }
  0xcb   :  { %v1126_v63 = vrot.slane %v1124_v27, 2  ;;  %v1129_v4 = vrot.slane %v1127_v41, 3  ;;  %v1059_v13 = vpop.permute.xlu0 %1058  ;;  %v1137_v19 = vor.u32 %v1136_v33, %v1133_v26  ;;  %v1122_v5 = vrot.slane %v1065_v28, 2 }
  0xcc   :  { %v1063_v29 = vsel %vm828_vm9, %v2932_v55, %v1059_v13 }
  0xcd   :  { %v1130_v17 = vor.u32 %v1129_v4, %v1126_v63  ;;  %v1121_v24 = vrot.slane %v1063_v29, 2  ;;  %v760_v22 = vpop.permute.xlu1 %759 }
  0xce   :  { %1617 = vmatmul.mubr.msk.bf16.gmra.mrb[20].mxu1 %vm828_vm9, %v821_v38  ;;  %v766_v48 = vsel %vm370_vm7, %v741_v46, %v760_v22 }
  0xcf   :  { %v1123_v7 = vsel %vm802_vm14, %v1121_v24, %v1122_v5  ;;  %v1138_v18 = vsel %vm806_vm15, %v1130_v17, %v1137_v19  ;;  %v826_v23 = vrot.slane %v766_v48, 3  ;;  %v758_v15 = vpop.permute.xlu0 %757  ;;  %1620 = vmatprep.mubr.msk.bf16.mxu1 %vm1743_vm8, %v3142_v25 }
  0xd0   :  { %1638 = vmatprep.mubr.msk.bf16.mxu0 %vm1139_vm13, %v1123_v7  ;;  %v763_v55 = vsel %vm370_vm7, %v740_v3, %v758_v15 }
  0xd1   :  { %1639 = vmatmul.mubr.msk.bf16.gmra.mrb[24].mxu0 %vm1139_vm13, %v1138_v18  ;;  %v825_v50 = vrot.slane %v763_v55, 3 }
  0xd2   :  { %1646 = vmatprep.mubr.msk.bf16.mxu0 %vm1743_vm8, %v3142_v25 }
  0xd3   :  { %v827_v12 = vsel %vm824_vm0, %v825_v50, %v826_v23 }
  0xd6   :  { %1621 = vmatmul.mubr.msk.bf16.gmra.mrb[24].mxu1 %vm828_vm9, %v827_v12 }
  0xd7   :  { %1654 = vmatprep.mubr.msk.bf16.mxu1 %vm1743_vm8, %v3142_v25 }
 0x136   :  { %v1578_v21 = vpop.f32.mrb[0].mxu0 }
 0x137   :  { %v429_v11 = vpop.f32.mrb[1].mxu0 }
 0x138   :  { %v492_v32 = vmax.f32 %v429_v11, %v1578_v21  ;;  %v1579_v49 = vpop.f32.mrb[2].mxu0 }
 0x139   :  { %v432_v54 = vpop.f32.mrb[3].mxu0 }
 0x13a   :  { %v493_v20 = vmax.f32 %v432_v54, %v1579_v49 }
 0x13e   :  { %v1582_v59 = vpop.f32.mrb[4].mxu0 }
 0x13f   :  { %v445_v6 = vpop.f32.mrb[5].mxu0 }
 0x140   :  { %v494_v34 = vmax.f32 %v492_v32, %v445_v6  ;;  %v1583_v35 = vpop.f32.mrb[6].mxu0 }
 0x141   :  { %v448_v58 = vpop.f32.mrb[7].mxu0 }
 0x142   :  { %v495_v62 = vmax.f32 %v493_v20, %v448_v58  ;;  %v496_v51 = vmax.f32 %v494_v34, %v1582_v59 }
 0x144   :  { %v497_v36 = vmax.f32 %v495_v62, %v1583_v35 }
 0x156   :  { %v1586_v16 = vpop.f32.mrb[8].mxu0 }
 0x157   :  { %v461_v57 = vpop.f32.mrb[9].mxu0 }
 0x158   :  { %v498_v52 = vmax.f32 %v496_v51, %v461_v57  ;;  %v1587_v39 = vpop.f32.mrb[10].mxu0 }
 0x159   :  { %v464_v40 = vpop.f32.mrb[11].mxu0 }
 0x15a   :  { %v499_v10 = vmax.f32 %v497_v36, %v464_v40  ;;  %v500_v43 = vmax.f32 %v498_v52, %v1586_v16  ;;  %v1280_v40 = vld [vmem:[%s3131_s8 + $0x8] sm:$0xff] }
 0x15c   :  { %v501_v61 = vmax.f32 %v499_v10, %v1587_v39  ;;  %v1279_v39 = vld [vmem:[%s3131_s8] sm:$0xff] }
 0x168   :  { %v3022_v0 = vpop.f32.mrb[12].mxu0 }
 0x169   :  { %v477_v31 = vpop.f32.mrb[13].mxu0 }
 0x16a   :  { %v3024_v14 = vmax.f32 %v500_v43, %v477_v31  ;;  %v3026_v44 = vpop.f32.mrb[14].mxu0 }
 0x16b   :  { %v480_v9 = vpop.f32.mrb[15].mxu0 }
 0x16c   :  { %v504_v56 = vmax.f32 %v3024_v14, %v3022_v0  ;;  %v3030_v38 = vmax.f32 %v501_v61, %v480_v9  ;;  %v1283_v61 = vpack.c.bf16 %v1280_v40, %v1279_v39  ;;  %v1413_v0 = vld [vmem:[%s3135_s12] sm:$0xff]  ;;  %v1414_v14 = vld [vmem:[%s3135_s12 + $0x8] sm:$0xff] }
 0x16d   :  { %v1529_v40 = vld [vmem:[%s3132_s9] ss:$0 sm:$0xff] }
 0x16e   :  { %v505_v53 = vmax.f32 %v3030_v38, %v3026_v44  ;;  %1643 = vmatpush3.bf16.msra.mxu0 %v1283_v61  ;;  %v1415_v44 = vld [vmem:[%s3135_s12 + $0x10] sm:$0xff]  ;;  %v1416_v38 = vld [vmem:[%s3135_s12 + $0x18] sm:$0xff] }
 0x16f   :  { %1644 = vmatprep.subr.bf16.mxu0 %v3142_v25 }
 0x172   :  { %v883_v42 = vpop.f32.mrb[0].mxu1 }
 0x173   :  { %v1598_v60 = vpop.f32.mrb[1].mxu1 }
 0x174   :  { %v886_v26 = vpop.f32.mrb[2].mxu1 }
 0x175   :  { %v1599_v33 = vpop.f32.mrb[3].mxu1 }
 0x181   :  { %v891_v1 = vpop.f32.mrb[4].mxu1 }
 0x182   :  { %v938_v27 = vmax.f32 %v883_v42, %v891_v1  ;;  %v1602_v41 = vpop.f32.mrb[5].mxu1 }
 0x183   :  { %v894_v28 = vpop.f32.mrb[6].mxu1  ;;  %v1281_v41 = vld [vmem:[%s3131_s8 + $0x10] sm:$0xff] }
 0x184   :  { %v939_v46 = vmax.f32 %v886_v26, %v894_v28  ;;  %v1603_v63 = vpop.f32.mrb[7].mxu1  ;;  %v1521_v26 = vld [vmem:[%s3128_s5] ss:$0 sm:$0xff]  ;;  %v1282_v28 = vld [vmem:[%s3131_s8 + $0x18] sm:$0xff] }
 0x185   :  { %v1528_v63 = vld [vmem:[%s3130_s7] ss:$0 sm:$0xff] }
 0x189   :  { %v899_v4 = vpop.f32.mrb[8].mxu1 }
 0x18a   :  { %v940_v13 = vmax.f32 %v938_v27, %v899_v4  ;;  %v1606_v29 = vpop.f32.mrb[9].mxu1  ;;  %v1284_v4 = vpack.c.bf16 %v1282_v28, %v1281_v41 }
 0x18b   :  { %v902_v3 = vpop.f32.mrb[10].mxu1  ;;  %v1632_v19 = vpop.f32.mrb[16].mxu0 }
 0x18c   :  { %v941_v5 = vmax.f32 %v939_v46, %v902_v3  ;;  %v1607_v17 = vpop.f32.mrb[11].mxu1  ;;  %v1191_v24 = vpop.f32.mrb[17].mxu0  ;;  %1645 = vmatpush3.bf16.msra.mxu0 %v1284_v4 }
 0x18d   :  { %v1238_v22 = vmax.f32 %v1191_v24, %v1632_v19  ;;  %v1633_v48 = vpop.f32.mrb[18].mxu0  ;;  %1658 = vmatprep.subr.bf16.mxu0 %v3142_v25 }
 0x18e   :  { %v1194_v7 = vpop.f32.mrb[19].mxu0 }
 0x18f   :  { %v1239_v18 = vmax.f32 %v1194_v7, %v1633_v48 }
 0x191   :  { %v907_v23 = vpop.f32.mrb[12].mxu1 }
 0x192   :  { %v942_v15 = vmax.f32 %v940_v13, %v907_v23  ;;  %v1610_v55 = vpop.f32.mrb[13].mxu1 }
 0x193   :  { %v910_v50 = vpop.f32.mrb[14].mxu1 }
 0x194   :  { %v943_v12 = vmax.f32 %v941_v5, %v910_v50  ;;  %v1611_v21 = vpop.f32.mrb[15].mxu1 }
 0x199   :  { %v915_v30 = vpop.f32.mrb[16].mxu1 }
 0x19a   :  { %v944_v2 = vmax.f32 %v942_v15, %v915_v30  ;;  %v1614_v8 = vpop.f32.mrb[17].mxu1 }
 0x19b   :  { %v918_v11 = vpop.f32.mrb[18].mxu1 }
 0x19c   :  { %v1636_v47 = vpop.f32.mrb[20].mxu0  ;;  %v945_v37 = vmax.f32 %v943_v12, %v918_v11  ;;  %v1615_v32 = vpop.f32.mrb[19].mxu1 }
 0x19d   :  { %v1207_v49 = vpop.f32.mrb[21].mxu0 }
 0x19e   :  { %v1240_v54 = vmax.f32 %v1238_v22, %v1207_v49  ;;  %v1637_v45 = vpop.f32.mrb[22].mxu0  ;;  %v1531_v49 = vld [vmem:[%s3134_s11] ss:$0 sm:$0xff] }
 0x19f   :  { %v1210_v20 = vpop.f32.mrb[23].mxu0 }
 0x1a0   :  { %v1241_v59 = vmax.f32 %v1239_v18, %v1210_v20  ;;  %v1242_v6 = vmax.f32 %v1240_v54, %v1636_v47  ;;  %v1513_v18 = vld [vmem:[%s3126_s3] ss:$0 sm:$0xff] }
 0x1a1   :  { %v923_v34 = vpop.f32.mrb[20].mxu1  ;;  %v512_v23 = vadd.f32 %v1513_v18, %v504_v56  ;;  %v513_v15 = vadd.f32 %v1513_v18, %v505_v53  ;;  %v1419_v56 = vpack.c.bf16 %v1414_v14, %v1413_v0  ;;  %v1420_v53 = vpack.c.bf16 %v1416_v38, %v1415_v44  ;;  %v1535_v18 = vld [vmem:[%s3136_s13] ss:$0 sm:$0xff] }
 0x1a2   :  { %v946_v35 = vmax.f32 %v944_v2, %v923_v34  ;;  %v1618_v58 = vpop.f32.mrb[21].mxu1  ;;  %v1243_v62 = vmax.f32 %v1241_v59, %v1637_v45 }
 0x1a3   :  { %v926_v51 = vpop.f32.mrb[22].mxu1  ;;  %v514_v12 = vmax.f32 %v512_v23, 0.0  ;;  %v515_v21 = vmax.f32 %v513_v15, 0.0 }
 0x1a4   :  { %v1640_v36 = vpop.f32.mrb[24].mxu0  ;;  %v947_v16 = vmax.f32 %v945_v37, %v926_v51  ;;  %v1619_v57 = vpop.f32.mrb[23].mxu1 }
 0x1a5   :  { %v1223_v52 = vpop.f32.mrb[25].mxu0 }
 0x1a6   :  { %v1244_v10 = vmax.f32 %v1242_v6, %v1223_v52  ;;  %v1641_v43 = vpop.f32.mrb[26].mxu0 }
 0x1a7   :  { %v1226_v31 = vpop.f32.mrb[27].mxu0 }
 0x1a8   :  { %v1246_v9 = vmax.f32 %v1244_v10, %v1640_v36  ;;  %v1245_v42 = vmax.f32 %v1243_v62, %v1226_v31 }
 0x1a9   :  { %v931_v60 = vpop.f32.mrb[24].mxu1 }
 0x1aa   :  { %v1247_v33 = vmax.f32 %v1245_v42, %v1641_v43  ;;  %v948_v1 = vmax.f32 %v946_v35, %v931_v60  ;;  %v1622_v27 = vpop.f32.mrb[25].mxu1  ;;  %v1254_v17 = vadd.f32 %v1528_v63, %v1246_v9  ;;  %v1417_v42 = vld [vmem:[%s3135_s12 + $0x20] sm:$0xff]  ;;  %v1418_v60 = vld [vmem:[%s3135_s12 + $0x28] sm:$0xff] }
 0x1ab   :  { %v934_v46 = vpop.f32.mrb[26].mxu1 }
 0x1ac   :  { %v949_v13 = vmax.f32 %v947_v16, %v934_v46  ;;  %v1623_v29 = vpop.f32.mrb[27].mxu1  ;;  %v956_v3 = vadd.f32 %v1521_v26, %v948_v1  ;;  %v1255_v22 = vadd.f32 %v1528_v63, %v1247_v33  ;;  %v1256_v48 = vmax.f32 %v1254_v17, 0.0 }
 0x1ad   :  { %v1421_v33 = vpack.c.bf16 %v1418_v60, %v1417_v42 }
 0x1ae   :  { %v958_v19 = vmax.f32 %v956_v3, 0.0  ;;  %v957_v5 = vadd.f32 %v1521_v26, %v949_v13  ;;  %v1257_v7 = vmax.f32 %v1255_v22, 0.0  ;;  %v1423_v3 = vld [vmem:[#allocation2] sm:$0xff] }
 0x1b0   :  { %1260 = vrot.lane.b32.xlu0 %v958_v19, %s1739_s24  ;;  %v959_v24 = vmax.f32 %v957_v5, 0.0  ;;  %v1424_v19 = vld [vmem:[#allocation2 + $0x8] sm:$0xff] }
 0x1b2   :  { %1262 = vrot.lane.b32.xlu1 %v959_v24, %s1739_s24 }
 0x1b4   :  { %1268 = vrot.lane.b32.xlu0 %v1256_v48, %s1741_s27 }
 0x1b6   :  { %1270 = vrot.lane.b32.xlu1 %v1257_v7, %s1741_s27 }
 0x222   :  { %v1261_v55 = vpop.permute.xlu0 %1260 }
 0x223   :  { %v1275_v2 = vsel %vm1274_vm1, %v514_v12, %v1261_v55 }
 0x224   :  { %v1263_v50 = vpop.permute.xlu1 %1262 }
 0x225   :  { %v1276_v8 = vsel %vm1274_vm1, %v515_v21, %v1263_v50 }
 0x226   :  { %v1269_v30 = vpop.permute.xlu0 %1268 }
 0x227   :  { %v1277_v47 = vsel %vm370_vm7, %v1275_v2, %v1269_v30 }
 0x228   :  { %v1271_v11 = vpop.permute.xlu1 %1270 }
 0x229   :  { %v1278_v37 = vsel %vm370_vm7, %v1276_v8, %v1271_v11 }
 0x22a   :  { %v1293_v32 = vpack.c.bf16 %v1278_v37, %v1277_v47 }
 0x22c   :  { %1647 = vmatmul.mubr.msk.bf16.vlgmr.msra.gmra.mrb[28].mxu0 %vm828_vm9, %v1293_v32  ;;  %1655 = vmatmul.mubr.msk.bf16.vlgmr.msra.gmra.mrb[28].mxu1 %vm828_vm9, %v1293_v32 }
 0x22d   :  { %1664 = vmatprep.mubr.msk.bf16.mxu0 %vm1743_vm8, %v3142_v25  ;;  %1659 = vmatpush3.bf16.msra.mxu0 %v1419_v56 }
 0x22e   :  { %1660 = vmatprep.subr.bf16.mxu0 %v3142_v25 }
 0x231   :  { %1661 = vmatpush3.bf16.msra.mxu0 %v1420_v53 }
 0x232   :  { %1662 = vmatprep.subr.bf16.mxu0 %v3142_v25 }
 0x235   :  { %1663 = vmatpush3.bf16.msra.mxu0 %v1421_v33 }
 0x2ff   :  { %v1337_v54 = vpop.f32.mrb[28].mxu0  ;;  %v1386_v45 = vpop.f32.mrb[28].mxu1 }
 0x300   :  { %v1387_v20 = vadd.f32 %v1531_v49, %v1386_v45  ;;  %v1648_v59 = vpop.f32.mrb[29].mxu0  ;;  %v1656_v6 = vpop.f32.mrb[29].mxu1  ;;  %v1338_v10 = vadd.f32 %v1529_v40, %v1337_v54 }
 0x301   :  { %v1340_v34 = vpop.f32.mrb[30].mxu0  ;;  %v1389_v35 = vpop.f32.mrb[30].mxu1 }
 0x302   :  { %v1533_v58 = vmul.f32 -1.442695, %v1387_v20  ;;  %v1390_v62 = vadd.f32 %v1531_v49, %v1389_v35  ;;  %v1649_v51 = vpop.f32.mrb[31].mxu0  ;;  %v1657_v36 = vpop.f32.mrb[31].mxu1  ;;  %v1341_v43 = vadd.f32 %v1529_v40, %v1340_v34  ;;  %v1344_v31 = vmax.f32 %v1338_v10, 0.0 }
 0x304   :  { %1681 = vpow2.f32 %v1533_v58  ;;  %v1534_v16 = vmul.f32 -1.442695, %v1390_v62  ;;  %v1345_v1 = vmax.f32 %v1341_v43, 0.0 }
 0x306   :  { %1683 = vpow2.f32 %v1534_v16 }
 0x30e   :  { %v1682_v57 = vpop.eup %1681 }
 0x30f   :  { %v1399_v25 = vadd.f32 1.0, %v1682_v57 }
 0x310   :  { %v1684_v52 = vpop.eup %1683 }
 0x311   :  { %1685 = vrcp.f32 %v1399_v25  ;;  %v1400_v39 = vadd.f32 1.0, %v1684_v52 }
 0x313   :  { %1687 = vrcp.f32 %v1400_v39 }
 0x31b   :  { %v1686_v61 = vpop.eup %1685 }
 0x31c   :  { %v1407_v9 = vsub.f32 1.0, %v1686_v61  ;;  %v1405_v27 = vmul.f32 %v1686_v61, %v1277_v47 }
 0x31d   :  { %v1688_v26 = vpop.eup %1687 }
 0x31e   :  { %v1408_v41 = vsub.f32 1.0, %v1688_v26  ;;  %v1409_v28 = vmul.f32 %v1407_v9, %v1344_v31  ;;  %v1406_v46 = vmul.f32 %v1688_v26, %v1278_v37 }
 0x320   :  { %v1410_v63 = vmul.f32 %v1408_v41, %v1345_v1  ;;  %v1411_v4 = vadd.f32 %v1409_v28, %v1405_v27 }
 0x322   :  { %v1412_v13 = vadd.f32 %v1410_v63, %v1406_v46 }
 0x324   :  { %v1676_v29 = vpack.i.bf16 %v1412_v13, %v1411_v4 }
 0x326   :  { %1677 = vrot.lane.b32.xlu0 %v1676_v29, %s1741_s27  ;;  %s1711_s27 = scalar_lea.vmem %s1494_s18, 256 }
 0x327   :  { %p1712_p8 = scmp.ne.s32.totalorder %s1494_s18, %s1711_s27  ;;  %p1717_p10 = scmp.lt.s32.totalorder %s1711_s27, %s1711_s27 }
 0x329   :  { %p1718_p11 = por %p1717_p10, %p1716_p9 }
 0x32b   :  { %p1719_p12 = pnand %p1718_p11, %p1712_p8 }
 0x398   :  { %v1678_v5 = vpop.permute.xlu0 %1677 }
 0x399   :  { %v1680_v17 = vunpack.i.h.bf16 %v1678_v5  ;;  %v1679_v24 = vunpack.i.l.bf16 %v1678_v5 }
 0x39b   :  { %v1434_v22 = vsel %vm370_vm7, %v1424_v19, %v1680_v17  ;;  %v1433_v48 = vsel %vm370_vm7, %v1423_v3, %v1679_v24 }
 0x39c   :  { %v1435_v7 = vpack.c.bf16 %v1434_v22, %v1433_v48 }
 0x39e   :  { %1665 = vmatmul.mubr.msk.bf16.vlgmr.msra.gmra.mrb[32].mxu0 %vm1139_vm13, %v1435_v7 }
 0x471   :  { %v1479_v23 = vpop.f32.mrb[32].mxu0 }
 0x472   :  { %v1480_v15 = vadd.f32 %v1535_v18, %v1479_v23  ;;  %v1666_v55 = vpop.f32.mrb[33].mxu0 }
 0x473   :  { %v1482_v50 = vpop.f32.mrb[34].mxu0 }
 0x474   :  { %1486 = vst.msk [vmem:[#allocation5] sm:$0xff] %vm828_vm9, %v1480_v15  ;;  %v1483_v12 = vadd.f32 %v1535_v18, %v1482_v50  ;;  %v1667_v21 = vpop.f32.mrb[35].mxu0 }
 0x476   :  { %1487 = vst.msk [vmem:[#allocation5 + $0x8] sm:$0xff] %vm828_vm9, %v1483_v12 }
 0x477   :  { %1722 = shalt.err (!%p1719_p12)
}
 0x478   :  { %s1723_s1 = scalar_lea.hbm %s3137_s14, 256 }
 0x479   :  { %p1724_p13 = scmp.ne.s32.totalorder %s3137_s14, %s1723_s1  ;;  %p1727_p0 = scmp.lt.u32.totalorder %s1723_s1, %s3137_s14 }
 0x47b   :  { %p1729_p1 = pnand %p1727_p0, %p1724_p13 }
 0x47d   :  { %1732 = shalt.err (!%p1729_p1)
}
 0x47e   :  { %1499 = dma.vmem_to_hbm [thread:$0]  %s1494_s18, 256, %s3137_s14, [#allocation4], %s1738_s23, %s1738_s23, %s1739_s24  }
 0x47f   :  { %1735 = dma.done.wait [#allocation4], 256  }
 0x480   :  { %1736 = vsyncadd [#allocation4], 4294967040 }
 0x481   :  { %1503 = vsyncpa [#allocation3], 1 }
 0x482   :  { %1504 = vsyncpa [#allocation4], 1 }

</bundles_post_ra>
